<compile_context>
chip_gen: v5e
topology: v5e:2x2
jax: 0.10.0
libtpu: 0.0.40
codegen_flags: <defaults>
</compile_context>

<pallas_src>
import math

import jax
import jax.numpy as jnp
from jax.experimental import pallas as pl


def make_kernel(num_encoders: int, nhead: int):
    E, H = num_encoders, nhead

    def kernel(q_ref, enc_ref, wq_ref, bq_ref, wk_ref, bk_ref, wv_ref, bv_ref,
               wof_ref, mask_ref, bias_ref, gamma_ref, beta_ref, out_ref):
        q = q_ref[...]                                  # (B, T, D) f32
        fused = jnp.zeros(q.shape, jnp.float32)

        for e in range(E):                              # static, unrolled
            kv = enc_ref[e]                             # (B, S, D)
            add_mask = mask_ref[e]                      # (B, 1, S) additive (0 / -1e30)

            for h in range(H):                          # static, unrolled
                # Per-head projections: the head split lives in the wrapper-
                # repacked weights, so no lane slicing of activations here.
                # wq/bq are pre-scaled by 1/sqrt(Dh) wrapper-side.
                qh = jnp.einsum('btd,de->bte', q, wq_ref[e, h],
                                preferred_element_type=jnp.float32) + bq_ref[e, h]
                kh = jnp.einsum('bsd,de->bse', kv, wk_ref[e, h],
                                preferred_element_type=jnp.float32) + bk_ref[e, h]
                vh = jnp.einsum('bsd,de->bse', kv, wv_ref[e, h],
                                preferred_element_type=jnp.float32) + bv_ref[e, h]

                s = jnp.einsum('bte,bse->bts', qh, kh,
                               preferred_element_type=jnp.float32)
                s = s + add_mask                        # key padding mask
                m = jnp.max(s, axis=-1, keepdims=True)
                p = jnp.exp(s - m)
                inv = pl.reciprocal(jnp.sum(p, axis=-1, keepdims=True), approx=True)
                ctx = jnp.einsum('bts,bse->bte', p, vh,
                                 preferred_element_type=jnp.float32) * inv

                # Accumulate through the folded projection wof = (wo @ fw)/E,
                # per head (rows h*Dh:(h+1)*Dh of wof) -> no head concat,
                # no separate fusion matmul, no post-hoc 1/E scaling.
                fused = fused + jnp.einsum('bte,ed->btd', ctx, wof_ref[e, h],
                                           preferred_element_type=jnp.float32)

        fused = fused + bias_ref[...]                   # folded (sum_e bo@fw)/E + fusion_bias
        # TODO(synk): nn.Dropout is identity here (eval-mode semantics)
        x = q + fused
        mu = jnp.mean(x, axis=-1, keepdims=True)
        var = jnp.mean((x - mu) ** 2, axis=-1, keepdims=True)
        xn = (x - mu) * jax.lax.rsqrt(var + 1e-5)
        out_ref[...] = (xn * gamma_ref[...] + beta_ref[...]).astype(out_ref.dtype)

    return kernel


def modular_cross_attention_pallas(query, enc_stack, params, add_mask):
    """query: (B,T,D); enc_stack: (E,B,S,D); add_mask: (E,B,1,S) additive f32."""
    B, T, D = query.shape
    E, _, S, _ = enc_stack.shape
    H = params['nhead']
    Dh = D // H
    scale = 1.0 / math.sqrt(Dh)

    # ---- one-time wrapper-side weight repacking (layout only; in a real model
    # this would be folded at parameter-load time) ---------------------------
    def per_head_cols(w):        # (E, D, D) -> (E, H, D, Dh); head h = cols h*Dh:(h+1)*Dh
        return jnp.transpose(w.reshape(E, D, H, Dh), (0, 2, 1, 3))

    def per_head_bias(b):        # (E, 1, D) -> (E, H, 1, Dh)
        return b.reshape(E, H, Dh)[:, :, None, :]

    # Fold the attention scale into the query projection (weights + bias).
    wq_r = per_head_cols(params['wq']) * scale
    wk_r = per_head_cols(params['wk'])
    wv_r = per_head_cols(params['wv'])
    bq_r = per_head_bias(params['bq']) * scale
    bk_r = per_head_bias(params['bk'])
    bv_r = per_head_bias(params['bv'])

    # Fold MHA out_proj with the per-encoder fusion matmul AND the 1/E
    # fusion average:  wof = (wo @ fw) / E.
    wof = jnp.einsum('eij,ejk->eik', params['wo'], params['fw']) * (1.0 / E)
    wof_r = wof.reshape(E, H, Dh, D)          # head h = rows h*Dh:(h+1)*Dh
    # Folded bias:  (sum_e bo_e @ fw_e) / E + fusion_bias
    bias_fused = (jnp.einsum('ed,edk->k', params['bo'][:, 0, :], params['fw']) / E
                  + params['fb'][0, 0]).reshape(1, 1, D)

    kernel = make_kernel(E, H)

    # Single invocation, no grid: every operand (a few hundred KB total) fits
    # in VMEM, so whole-array default BlockSpecs are used.
    fn = pl.pallas_call(
        kernel,
        out_shape=jax.ShapeDtypeStruct((B, T, D), jnp.float32),
    )
    return fn(query, enc_stack, wq_r, bq_r, wk_r, bk_r, wv_r, bv_r,
              wof_r, add_mask, bias_fused, params['gamma'], params['beta'])


def reference_jax(query, enc_stack, params, add_mask):
    """Pure-JAX reference with the module's math (for correctness check)."""
    E, B, S, D = enc_stack.shape
    T = query.shape[1]
    H = params['nhead']
    Dh = D // H
    fused = jnp.zeros_like(query)
    for e in range(E):
        kv = enc_stack[e]
        Q = query @ params['wq'][e] + params['bq'][e, 0]
        K = kv @ params['wk'][e] + params['bk'][e, 0]
        V = kv @ params['wv'][e] + params['bv'][e, 0]
        Qh = Q.reshape(B, T, H, Dh).transpose(0, 2, 1, 3)
        Kh = K.reshape(B, S, H, Dh).transpose(0, 2, 1, 3)
        Vh = V.reshape(B, S, H, Dh).transpose(0, 2, 1, 3)
        s = jnp.einsum('bhtd,bhsd->bhts', Qh, Kh) / math.sqrt(Dh)
        s = s + add_mask[e][:, :, None, :]              # (B,1,1,S)
        p = jax.nn.softmax(s, axis=-1)
        ctx = jnp.einsum('bhts,bhsd->bhtd', p, Vh).transpose(0, 2, 1, 3).reshape(B, T, D)
        attn = ctx @ params['wo'][e] + params['bo'][e, 0]
        fused = fused + attn @ params['fw'][e]
    fused = fused / E + params['fb'][0, 0]
    x = query + fused
    mu = x.mean(-1, keepdims=True)
    var = ((x - mu) ** 2).mean(-1, keepdims=True)
    return (x - mu) / jnp.sqrt(var + 1e-5) * params['gamma'][0, 0] + params['beta'][0, 0]


if __name__ == "__main__":
    # Small shapes consistent with the module's forward.
    E = 2          # encoders: ["enc_a", "enc_b"]
    B, T, S = 2, 8, 8
    D, H = 32, 4

    key = jax.random.PRNGKey(0)
    ks = jax.random.split(key, 12)
    init = lambda k, shape, sc=0.08: (sc * jax.random.normal(k, shape)).astype(jnp.float32)

    params = {
        'nhead': H,
        # MultiheadAttention in_proj / out_proj (Wq/Wk/Wv/Wo as (D,D), applied as x @ W)
        'wq': init(ks[0], (E, D, D)),
        'wk': init(ks[1], (E, D, D)),
        'wv': init(ks[2], (E, D, D)),
        'wo': init(ks[3], (E, D, D)),
        'bq': jnp.zeros((E, 1, D), jnp.float32),
        'bk': jnp.zeros((E, 1, D), jnp.float32),
        'bv': jnp.zeros((E, 1, D), jnp.float32),
        'bo': jnp.zeros((E, 1, D), jnp.float32),
        # fusion_weights (E, D, D) xavier-ish, fusion_bias zeros
        'fw': init(ks[4], (E, D, D), sc=math.sqrt(2.0 / (D + D))),
        'fb': jnp.zeros((1, 1, D), jnp.float32),
        # LayerNorm affine
        'gamma': jnp.ones((1, 1, D), jnp.float32),
        'beta': jnp.zeros((1, 1, D), jnp.float32),
    }

    query = init(ks[5], (B, T, D), sc=1.0)
    enc_stack = init(ks[6], (E, B, S, D), sc=1.0)

    # key_padding_mask: True where padded (PyTorch convention). Pad the last
    # two source positions of encoder 0 / batch 1 to exercise the mask path.
    # NOTE: fully-masked rows would yield a uniform distribution here instead
    # of PyTorch's NaN propagation (same behavior as the previous version).
    kpm = jnp.zeros((E, B, S), dtype=bool)
    kpm = kpm.at[0, 1, -2:].set(True)
    add_mask = jnp.where(kpm, -1e30, 0.0).astype(jnp.float32).reshape(E, B, 1, S)

    out = modular_cross_attention_pallas(query, enc_stack, params, add_mask)
    out = jax.block_until_ready(out)

    ref = reference_jax(query, enc_stack, params, add_mask)
    assert out.shape == (B, T, D)
    assert jnp.allclose(out, ref, rtol=2e-3, atol=2e-3), (
        f"max abs err {jnp.max(jnp.abs(out - ref))}")

    print("KERNEL_OK")
</pallas_src>

<mosaic_0001>
module attributes {stable_mosaic.version = 11 : i64} {
  func.func @kernel(%arg0: memref<2x8x32xf32, #tpu.memory_space<vmem>>, %arg1: memref<2x2x8x32xf32, #tpu.memory_space<vmem>>, %arg2: memref<2x4x32x8xf32, #tpu.memory_space<vmem>>, %arg3: memref<2x4x1x8xf32, #tpu.memory_space<vmem>>, %arg4: memref<2x4x32x8xf32, #tpu.memory_space<vmem>>, %arg5: memref<2x4x1x8xf32, #tpu.memory_space<vmem>>, %arg6: memref<2x4x32x8xf32, #tpu.memory_space<vmem>>, %arg7: memref<2x4x1x8xf32, #tpu.memory_space<vmem>>, %arg8: memref<2x4x8x32xf32, #tpu.memory_space<vmem>>, %arg9: memref<2x2x1x8xf32, #tpu.memory_space<vmem>>, %arg10: memref<1x1x32xf32, #tpu.memory_space<vmem>>, %arg11: memref<1x1x32xf32, #tpu.memory_space<vmem>>, %arg12: memref<1x1x32xf32, #tpu.memory_space<vmem>>, %arg13: memref<2x8x32xf32, #tpu.memory_space<vmem>>) attributes {dimension_semantics = [], scalar_prefetch = 0 : i64, scratch_operands = 0 : i64, tpu.core_type = #tpu.core_type<tc>} {
    %c0 = arith.constant 0 : index
    %c0_0 = arith.constant 0 : index
    %c0_1 = arith.constant 0 : index
    %0 = vector.load %arg0[%c0, %c0_0, %c0_1] : memref<2x8x32xf32, #tpu.memory_space<vmem>>, vector<2x8x32xf32>
    %cst = arith.constant 0.000000e+00 : f32
    %1 = vector.broadcast %cst : f32 to vector<2x8x32xf32>
    %c0_2 = arith.constant 0 : index
    %c0_3 = arith.constant 0 : index
    %c0_4 = arith.constant 0 : index
    %c0_5 = arith.constant 0 : index
    %2 = vector.load %arg1[%c0_2, %c0_3, %c0_4, %c0_5] : memref<2x2x8x32xf32, #tpu.memory_space<vmem>>, vector<1x2x8x32xf32>
    %3 = vector.shape_cast %2 : vector<1x2x8x32xf32> to vector<2x8x32xf32>
    %c0_6 = arith.constant 0 : index
    %c0_7 = arith.constant 0 : index
    %c0_8 = arith.constant 0 : index
    %c0_9 = arith.constant 0 : index
    %4 = vector.load %arg9[%c0_6, %c0_7, %c0_8, %c0_9] : memref<2x2x1x8xf32, #tpu.memory_space<vmem>>, vector<1x2x1x8xf32>
    %5 = vector.shape_cast %4 : vector<1x2x1x8xf32> to vector<2x1x8xf32>
    %c0_10 = arith.constant 0 : index
    %c0_11 = arith.constant 0 : index
    %c0_12 = arith.constant 0 : index
    %c0_13 = arith.constant 0 : index
    %6 = vector.load %arg2[%c0_10, %c0_11, %c0_12, %c0_13] : memref<2x4x32x8xf32, #tpu.memory_space<vmem>>, vector<1x1x32x8xf32>
    %7 = vector.shape_cast %6 : vector<1x1x32x8xf32> to vector<32x8xf32>
    "tpu.trace_start"() <{level = 10 : i32, message = "btd,de->bte"}> : () -> ()
    %cst_14 = arith.constant dense<0.000000e+00> : vector<2x8x8xf32>
    %8 = tpu.matmul %0, %7, %cst_14 {dimension_numbers = #tpu.dot_dimension_numbers<[2], [0], [0, 1], [1], [0, 0, 0, 1, 1, 1], [], []>} : vector<2x8x32xf32>, vector<32x8xf32>, vector<2x8x8xf32> -> vector<2x8x8xf32>
    "tpu.trace_stop"() : () -> ()
    %c0_15 = arith.constant 0 : index
    %c0_16 = arith.constant 0 : index
    %c0_17 = arith.constant 0 : index
    %c0_18 = arith.constant 0 : index
    %9 = vector.load %arg3[%c0_15, %c0_16, %c0_17, %c0_18] : memref<2x4x1x8xf32, #tpu.memory_space<vmem>>, vector<1x1x1x8xf32>
    %10 = vector.shape_cast %9 : vector<1x1x1x8xf32> to vector<1x8xf32>
    %11 = vector.shape_cast %10 : vector<1x8xf32> to vector<1x1x8xf32>
    %12 = vector.broadcast %11 : vector<1x1x8xf32> to vector<2x8x8xf32>
    %13 = arith.addf %8, %12 : vector<2x8x8xf32>
    %c0_19 = arith.constant 0 : index
    %c0_20 = arith.constant 0 : index
    %c0_21 = arith.constant 0 : index
    %c0_22 = arith.constant 0 : index
    %14 = vector.load %arg4[%c0_19, %c0_20, %c0_21, %c0_22] : memref<2x4x32x8xf32, #tpu.memory_space<vmem>>, vector<1x1x32x8xf32>
    %15 = vector.shape_cast %14 : vector<1x1x32x8xf32> to vector<32x8xf32>
    "tpu.trace_start"() <{level = 10 : i32, message = "bsd,de->bse"}> : () -> ()
    %cst_23 = arith.constant dense<0.000000e+00> : vector<2x8x8xf32>
    %16 = tpu.matmul %3, %15, %cst_23 {dimension_numbers = #tpu.dot_dimension_numbers<[2], [0], [0, 1], [1], [0, 0, 0, 1, 1, 1], [], []>} : vector<2x8x32xf32>, vector<32x8xf32>, vector<2x8x8xf32> -> vector<2x8x8xf32>
    "tpu.trace_stop"() : () -> ()
    %c0_24 = arith.constant 0 : index
    %c0_25 = arith.constant 0 : index
    %c0_26 = arith.constant 0 : index
    %c0_27 = arith.constant 0 : index
    %17 = vector.load %arg5[%c0_24, %c0_25, %c0_26, %c0_27] : memref<2x4x1x8xf32, #tpu.memory_space<vmem>>, vector<1x1x1x8xf32>
    %18 = vector.shape_cast %17 : vector<1x1x1x8xf32> to vector<1x8xf32>
    %19 = vector.shape_cast %18 : vector<1x8xf32> to vector<1x1x8xf32>
    %20 = vector.broadcast %19 : vector<1x1x8xf32> to vector<2x8x8xf32>
    %21 = arith.addf %16, %20 : vector<2x8x8xf32>
    %c0_28 = arith.constant 0 : index
    %c0_29 = arith.constant 0 : index
    %c0_30 = arith.constant 0 : index
    %c0_31 = arith.constant 0 : index
    %22 = vector.load %arg6[%c0_28, %c0_29, %c0_30, %c0_31] : memref<2x4x32x8xf32, #tpu.memory_space<vmem>>, vector<1x1x32x8xf32>
    %23 = vector.shape_cast %22 : vector<1x1x32x8xf32> to vector<32x8xf32>
    "tpu.trace_start"() <{level = 10 : i32, message = "bsd,de->bse"}> : () -> ()
    %cst_32 = arith.constant dense<0.000000e+00> : vector<2x8x8xf32>
    %24 = tpu.matmul %3, %23, %cst_32 {dimension_numbers = #tpu.dot_dimension_numbers<[2], [0], [0, 1], [1], [0, 0, 0, 1, 1, 1], [], []>} : vector<2x8x32xf32>, vector<32x8xf32>, vector<2x8x8xf32> -> vector<2x8x8xf32>
    "tpu.trace_stop"() : () -> ()
    %c0_33 = arith.constant 0 : index
    %c0_34 = arith.constant 0 : index
    %c0_35 = arith.constant 0 : index
    %c0_36 = arith.constant 0 : index
    %25 = vector.load %arg7[%c0_33, %c0_34, %c0_35, %c0_36] : memref<2x4x1x8xf32, #tpu.memory_space<vmem>>, vector<1x1x1x8xf32>
    %26 = vector.shape_cast %25 : vector<1x1x1x8xf32> to vector<1x8xf32>
    %27 = vector.shape_cast %26 : vector<1x8xf32> to vector<1x1x8xf32>
    %28 = vector.broadcast %27 : vector<1x1x8xf32> to vector<2x8x8xf32>
    %29 = arith.addf %24, %28 : vector<2x8x8xf32>
    "tpu.trace_start"() <{level = 10 : i32, message = "bte,bse->bts"}> : () -> ()
    %cst_37 = arith.constant dense<0.000000e+00> : vector<2x8x8xf32>
    %30 = tpu.matmul %13, %21, %cst_37 {dimension_numbers = #tpu.dot_dimension_numbers<[2], [2], [1], [1], [0, 0, 0, 1, 1, 1], [0], [0]>} : vector<2x8x8xf32>, vector<2x8x8xf32>, vector<2x8x8xf32> -> vector<2x8x8xf32>
    "tpu.trace_stop"() : () -> ()
    %31 = vector.broadcast %5 : vector<2x1x8xf32> to vector<2x8x8xf32>
    %32 = arith.addf %30, %31 : vector<2x8x8xf32>
    %cst_38 = arith.constant dense<0xFF800000> : vector<2x8xf32>
    %33 = vector.multi_reduction <maximumf>, %32, %cst_38 [2] : vector<2x8x8xf32> to vector<2x8xf32>
    %34 = vector.shape_cast %33 : vector<2x8xf32> to vector<2x8x1xf32>
    %35 = vector.broadcast %34 : vector<2x8x1xf32> to vector<2x8x8xf32>
    %36 = arith.subf %32, %35 : vector<2x8x8xf32>
    %37 = math.exp %36 : vector<2x8x8xf32>
    %cst_39 = arith.constant dense<0.000000e+00> : vector<2x8xf32>
    %38 = vector.multi_reduction <add>, %37, %cst_39 [2] : vector<2x8x8xf32> to vector<2x8xf32>
    %39 = vector.shape_cast %38 : vector<2x8xf32> to vector<2x8x1xf32>
    %40 = tpu.reciprocal %39 {approx = true} : vector<2x8x1xf32> -> vector<2x8x1xf32>
    "tpu.trace_start"() <{level = 10 : i32, message = "bts,bse->bte"}> : () -> ()
    %cst_40 = arith.constant dense<0.000000e+00> : vector<2x8x8xf32>
    %41 = tpu.matmul %37, %29, %cst_40 {dimension_numbers = #tpu.dot_dimension_numbers<[2], [1], [1], [2], [0, 0, 0, 1, 1, 2], [0], [0]>} : vector<2x8x8xf32>, vector<2x8x8xf32>, vector<2x8x8xf32> -> vector<2x8x8xf32>
    "tpu.trace_stop"() : () -> ()
    %42 = vector.broadcast %40 : vector<2x8x1xf32> to vector<2x8x8xf32>
    %43 = arith.mulf %41, %42 : vector<2x8x8xf32>
    %c0_41 = arith.constant 0 : index
    %c0_42 = arith.constant 0 : index
    %c0_43 = arith.constant 0 : index
    %c0_44 = arith.constant 0 : index
    %44 = vector.load %arg8[%c0_41, %c0_42, %c0_43, %c0_44] : memref<2x4x8x32xf32, #tpu.memory_space<vmem>>, vector<1x1x8x32xf32>
    %45 = vector.shape_cast %44 : vector<1x1x8x32xf32> to vector<8x32xf32>
    "tpu.trace_start"() <{level = 10 : i32, message = "bte,ed->btd"}> : () -> ()
    %cst_45 = arith.constant dense<0.000000e+00> : vector<2x8x32xf32>
    %46 = tpu.matmul %43, %45, %cst_45 {dimension_numbers = #tpu.dot_dimension_numbers<[2], [0], [0, 1], [1], [0, 0, 0, 1, 1, 1], [], []>} : vector<2x8x8xf32>, vector<8x32xf32>, vector<2x8x32xf32> -> vector<2x8x32xf32>
    "tpu.trace_stop"() : () -> ()
    %47 = arith.addf %1, %46 : vector<2x8x32xf32>
    %c0_46 = arith.constant 0 : index
    %c1 = arith.constant 1 : index
    %c0_47 = arith.constant 0 : index
    %c0_48 = arith.constant 0 : index
    %48 = vector.load %arg2[%c0_46, %c1, %c0_47, %c0_48] : memref<2x4x32x8xf32, #tpu.memory_space<vmem>>, vector<1x1x32x8xf32>
    %49 = vector.shape_cast %48 : vector<1x1x32x8xf32> to vector<32x8xf32>
    "tpu.trace_start"() <{level = 10 : i32, message = "btd,de->bte"}> : () -> ()
    %cst_49 = arith.constant dense<0.000000e+00> : vector<2x8x8xf32>
    %50 = tpu.matmul %0, %49, %cst_49 {dimension_numbers = #tpu.dot_dimension_numbers<[2], [0], [0, 1], [1], [0, 0, 0, 1, 1, 1], [], []>} : vector<2x8x32xf32>, vector<32x8xf32>, vector<2x8x8xf32> -> vector<2x8x8xf32>
    "tpu.trace_stop"() : () -> ()
    %c0_50 = arith.constant 0 : index
    %c1_51 = arith.constant 1 : index
    %c0_52 = arith.constant 0 : index
    %c0_53 = arith.constant 0 : index
    %51 = vector.load %arg3[%c0_50, %c1_51, %c0_52, %c0_53] : memref<2x4x1x8xf32, #tpu.memory_space<vmem>>, vector<1x1x1x8xf32>
    %52 = vector.shape_cast %51 : vector<1x1x1x8xf32> to vector<1x8xf32>
    %53 = vector.shape_cast %52 : vector<1x8xf32> to vector<1x1x8xf32>
    %54 = vector.broadcast %53 : vector<1x1x8xf32> to vector<2x8x8xf32>
    %55 = arith.addf %50, %54 : vector<2x8x8xf32>
    %c0_54 = arith.constant 0 : index
    %c1_55 = arith.constant 1 : index
    %c0_56 = arith.constant 0 : index
    %c0_57 = arith.constant 0 : index
    %56 = vector.load %arg4[%c0_54, %c1_55, %c0_56, %c0_57] : memref<2x4x32x8xf32, #tpu.memory_space<vmem>>, vector<1x1x32x8xf32>
    %57 = vector.shape_cast %56 : vector<1x1x32x8xf32> to vector<32x8xf32>
    "tpu.trace_start"() <{level = 10 : i32, message = "bsd,de->bse"}> : () -> ()
    %cst_58 = arith.constant dense<0.000000e+00> : vector<2x8x8xf32>
    %58 = tpu.matmul %3, %57, %cst_58 {dimension_numbers = #tpu.dot_dimension_numbers<[2], [0], [0, 1], [1], [0, 0, 0, 1, 1, 1], [], []>} : vector<2x8x32xf32>, vector<32x8xf32>, vector<2x8x8xf32> -> vector<2x8x8xf32>
    "tpu.trace_stop"() : () -> ()
    %c0_59 = arith.constant 0 : index
    %c1_60 = arith.constant 1 : index
    %c0_61 = arith.constant 0 : index
    %c0_62 = arith.constant 0 : index
    %59 = vector.load %arg5[%c0_59, %c1_60, %c0_61, %c0_62] : memref<2x4x1x8xf32, #tpu.memory_space<vmem>>, vector<1x1x1x8xf32>
    %60 = vector.shape_cast %59 : vector<1x1x1x8xf32> to vector<1x8xf32>
    %61 = vector.shape_cast %60 : vector<1x8xf32> to vector<1x1x8xf32>
    %62 = vector.broadcast %61 : vector<1x1x8xf32> to vector<2x8x8xf32>
    %63 = arith.addf %58, %62 : vector<2x8x8xf32>
    %c0_63 = arith.constant 0 : index
    %c1_64 = arith.constant 1 : index
    %c0_65 = arith.constant 0 : index
    %c0_66 = arith.constant 0 : index
    %64 = vector.load %arg6[%c0_63, %c1_64, %c0_65, %c0_66] : memref<2x4x32x8xf32, #tpu.memory_space<vmem>>, vector<1x1x32x8xf32>
    %65 = vector.shape_cast %64 : vector<1x1x32x8xf32> to vector<32x8xf32>
    "tpu.trace_start"() <{level = 10 : i32, message = "bsd,de->bse"}> : () -> ()
    %cst_67 = arith.constant dense<0.000000e+00> : vector<2x8x8xf32>
    %66 = tpu.matmul %3, %65, %cst_67 {dimension_numbers = #tpu.dot_dimension_numbers<[2], [0], [0, 1], [1], [0, 0, 0, 1, 1, 1], [], []>} : vector<2x8x32xf32>, vector<32x8xf32>, vector<2x8x8xf32> -> vector<2x8x8xf32>
    "tpu.trace_stop"() : () -> ()
    %c0_68 = arith.constant 0 : index
    %c1_69 = arith.constant 1 : index
    %c0_70 = arith.constant 0 : index
    %c0_71 = arith.constant 0 : index
    %67 = vector.load %arg7[%c0_68, %c1_69, %c0_70, %c0_71] : memref<2x4x1x8xf32, #tpu.memory_space<vmem>>, vector<1x1x1x8xf32>
    %68 = vector.shape_cast %67 : vector<1x1x1x8xf32> to vector<1x8xf32>
    %69 = vector.shape_cast %68 : vector<1x8xf32> to vector<1x1x8xf32>
    %70 = vector.broadcast %69 : vector<1x1x8xf32> to vector<2x8x8xf32>
    %71 = arith.addf %66, %70 : vector<2x8x8xf32>
    "tpu.trace_start"() <{level = 10 : i32, message = "bte,bse->bts"}> : () -> ()
    %cst_72 = arith.constant dense<0.000000e+00> : vector<2x8x8xf32>
    %72 = tpu.matmul %55, %63, %cst_72 {dimension_numbers = #tpu.dot_dimension_numbers<[2], [2], [1], [1], [0, 0, 0, 1, 1, 1], [0], [0]>} : vector<2x8x8xf32>, vector<2x8x8xf32>, vector<2x8x8xf32> -> vector<2x8x8xf32>
    "tpu.trace_stop"() : () -> ()
    %73 = vector.broadcast %5 : vector<2x1x8xf32> to vector<2x8x8xf32>
    %74 = arith.addf %72, %73 : vector<2x8x8xf32>
    %cst_73 = arith.constant dense<0xFF800000> : vector<2x8xf32>
    %75 = vector.multi_reduction <maximumf>, %74, %cst_73 [2] : vector<2x8x8xf32> to vector<2x8xf32>
    %76 = vector.shape_cast %75 : vector<2x8xf32> to vector<2x8x1xf32>
    %77 = vector.broadcast %76 : vector<2x8x1xf32> to vector<2x8x8xf32>
    %78 = arith.subf %74, %77 : vector<2x8x8xf32>
    %79 = math.exp %78 : vector<2x8x8xf32>
    %cst_74 = arith.constant dense<0.000000e+00> : vector<2x8xf32>
    %80 = vector.multi_reduction <add>, %79, %cst_74 [2] : vector<2x8x8xf32> to vector<2x8xf32>
    %81 = vector.shape_cast %80 : vector<2x8xf32> to vector<2x8x1xf32>
    %82 = tpu.reciprocal %81 {approx = true} : vector<2x8x1xf32> -> vector<2x8x1xf32>
    "tpu.trace_start"() <{level = 10 : i32, message = "bts,bse->bte"}> : () -> ()
    %cst_75 = arith.constant dense<0.000000e+00> : vector<2x8x8xf32>
    %83 = tpu.matmul %79, %71, %cst_75 {dimension_numbers = #tpu.dot_dimension_numbers<[2], [1], [1], [2], [0, 0, 0, 1, 1, 2], [0], [0]>} : vector<2x8x8xf32>, vector<2x8x8xf32>, vector<2x8x8xf32> -> vector<2x8x8xf32>
    "tpu.trace_stop"() : () -> ()
    %84 = vector.broadcast %82 : vector<2x8x1xf32> to vector<2x8x8xf32>
    %85 = arith.mulf %83, %84 : vector<2x8x8xf32>
    %c0_76 = arith.constant 0 : index
    %c1_77 = arith.constant 1 : index
    %c0_78 = arith.constant 0 : index
    %c0_79 = arith.constant 0 : index
    %86 = vector.load %arg8[%c0_76, %c1_77, %c0_78, %c0_79] : memref<2x4x8x32xf32, #tpu.memory_space<vmem>>, vector<1x1x8x32xf32>
    %87 = vector.shape_cast %86 : vector<1x1x8x32xf32> to vector<8x32xf32>
    "tpu.trace_start"() <{level = 10 : i32, message = "bte,ed->btd"}> : () -> ()
    %cst_80 = arith.constant dense<0.000000e+00> : vector<2x8x32xf32>
    %88 = tpu.matmul %85, %87, %cst_80 {dimension_numbers = #tpu.dot_dimension_numbers<[2], [0], [0, 1], [1], [0, 0, 0, 1, 1, 1], [], []>} : vector<2x8x8xf32>, vector<8x32xf32>, vector<2x8x32xf32> -> vector<2x8x32xf32>
    "tpu.trace_stop"() : () -> ()
    %89 = arith.addf %47, %88 : vector<2x8x32xf32>
    %c0_81 = arith.constant 0 : index
    %c2 = arith.constant 2 : index
    %c0_82 = arith.constant 0 : index
    %c0_83 = arith.constant 0 : index
    %90 = vector.load %arg2[%c0_81, %c2, %c0_82, %c0_83] : memref<2x4x32x8xf32, #tpu.memory_space<vmem>>, vector<1x1x32x8xf32>
    %91 = vector.shape_cast %90 : vector<1x1x32x8xf32> to vector<32x8xf32>
    "tpu.trace_start"() <{level = 10 : i32, message = "btd,de->bte"}> : () -> ()
    %cst_84 = arith.constant dense<0.000000e+00> : vector<2x8x8xf32>
    %92 = tpu.matmul %0, %91, %cst_84 {dimension_numbers = #tpu.dot_dimension_numbers<[2], [0], [0, 1], [1], [0, 0, 0, 1, 1, 1], [], []>} : vector<2x8x32xf32>, vector<32x8xf32>, vector<2x8x8xf32> -> vector<2x8x8xf32>
    "tpu.trace_stop"() : () -> ()
    %c0_85 = arith.constant 0 : index
    %c2_86 = arith.constant 2 : index
    %c0_87 = arith.constant 0 : index
    %c0_88 = arith.constant 0 : index
    %93 = vector.load %arg3[%c0_85, %c2_86, %c0_87, %c0_88] : memref<2x4x1x8xf32, #tpu.memory_space<vmem>>, vector<1x1x1x8xf32>
    %94 = vector.shape_cast %93 : vector<1x1x1x8xf32> to vector<1x8xf32>
    %95 = vector.shape_cast %94 : vector<1x8xf32> to vector<1x1x8xf32>
    %96 = vector.broadcast %95 : vector<1x1x8xf32> to vector<2x8x8xf32>
    %97 = arith.addf %92, %96 : vector<2x8x8xf32>
    %c0_89 = arith.constant 0 : index
    %c2_90 = arith.constant 2 : index
    %c0_91 = arith.constant 0 : index
    %c0_92 = arith.constant 0 : index
    %98 = vector.load %arg4[%c0_89, %c2_90, %c0_91, %c0_92] : memref<2x4x32x8xf32, #tpu.memory_space<vmem>>, vector<1x1x32x8xf32>
    %99 = vector.shape_cast %98 : vector<1x1x32x8xf32> to vector<32x8xf32>
    "tpu.trace_start"() <{level = 10 : i32, message = "bsd,de->bse"}> : () -> ()
    %cst_93 = arith.constant dense<0.000000e+00> : vector<2x8x8xf32>
    %100 = tpu.matmul %3, %99, %cst_93 {dimension_numbers = #tpu.dot_dimension_numbers<[2], [0], [0, 1], [1], [0, 0, 0, 1, 1, 1], [], []>} : vector<2x8x32xf32>, vector<32x8xf32>, vector<2x8x8xf32> -> vector<2x8x8xf32>
    "tpu.trace_stop"() : () -> ()
    %c0_94 = arith.constant 0 : index
    %c2_95 = arith.constant 2 : index
    %c0_96 = arith.constant 0 : index
    %c0_97 = arith.constant 0 : index
    %101 = vector.load %arg5[%c0_94, %c2_95, %c0_96, %c0_97] : memref<2x4x1x8xf32, #tpu.memory_space<vmem>>, vector<1x1x1x8xf32>
    %102 = vector.shape_cast %101 : vector<1x1x1x8xf32> to vector<1x8xf32>
    %103 = vector.shape_cast %102 : vector<1x8xf32> to vector<1x1x8xf32>
    %104 = vector.broadcast %103 : vector<1x1x8xf32> to vector<2x8x8xf32>
    %105 = arith.addf %100, %104 : vector<2x8x8xf32>
    %c0_98 = arith.constant 0 : index
    %c2_99 = arith.constant 2 : index
    %c0_100 = arith.constant 0 : index
    %c0_101 = arith.constant 0 : index
    %106 = vector.load %arg6[%c0_98, %c2_99, %c0_100, %c0_101] : memref<2x4x32x8xf32, #tpu.memory_space<vmem>>, vector<1x1x32x8xf32>
    %107 = vector.shape_cast %106 : vector<1x1x32x8xf32> to vector<32x8xf32>
    "tpu.trace_start"() <{level = 10 : i32, message = "bsd,de->bse"}> : () -> ()
    %cst_102 = arith.constant dense<0.000000e+00> : vector<2x8x8xf32>
    %108 = tpu.matmul %3, %107, %cst_102 {dimension_numbers = #tpu.dot_dimension_numbers<[2], [0], [0, 1], [1], [0, 0, 0, 1, 1, 1], [], []>} : vector<2x8x32xf32>, vector<32x8xf32>, vector<2x8x8xf32> -> vector<2x8x8xf32>
    "tpu.trace_stop"() : () -> ()
    %c0_103 = arith.constant 0 : index
    %c2_104 = arith.constant 2 : index
    %c0_105 = arith.constant 0 : index
    %c0_106 = arith.constant 0 : index
    %109 = vector.load %arg7[%c0_103, %c2_104, %c0_105, %c0_106] : memref<2x4x1x8xf32, #tpu.memory_space<vmem>>, vector<1x1x1x8xf32>
    %110 = vector.shape_cast %109 : vector<1x1x1x8xf32> to vector<1x8xf32>
    %111 = vector.shape_cast %110 : vector<1x8xf32> to vector<1x1x8xf32>
    %112 = vector.broadcast %111 : vector<1x1x8xf32> to vector<2x8x8xf32>
    %113 = arith.addf %108, %112 : vector<2x8x8xf32>
    "tpu.trace_start"() <{level = 10 : i32, message = "bte,bse->bts"}> : () -> ()
    %cst_107 = arith.constant dense<0.000000e+00> : vector<2x8x8xf32>
    %114 = tpu.matmul %97, %105, %cst_107 {dimension_numbers = #tpu.dot_dimension_numbers<[2], [2], [1], [1], [0, 0, 0, 1, 1, 1], [0], [0]>} : vector<2x8x8xf32>, vector<2x8x8xf32>, vector<2x8x8xf32> -> vector<2x8x8xf32>
    "tpu.trace_stop"() : () -> ()
    %115 = vector.broadcast %5 : vector<2x1x8xf32> to vector<2x8x8xf32>
    %116 = arith.addf %114, %115 : vector<2x8x8xf32>
    %cst_108 = arith.constant dense<0xFF800000> : vector<2x8xf32>
    %117 = vector.multi_reduction <maximumf>, %116, %cst_108 [2] : vector<2x8x8xf32> to vector<2x8xf32>
    %118 = vector.shape_cast %117 : vector<2x8xf32> to vector<2x8x1xf32>
    %119 = vector.broadcast %118 : vector<2x8x1xf32> to vector<2x8x8xf32>
    %120 = arith.subf %116, %119 : vector<2x8x8xf32>
    %121 = math.exp %120 : vector<2x8x8xf32>
    %cst_109 = arith.constant dense<0.000000e+00> : vector<2x8xf32>
    %122 = vector.multi_reduction <add>, %121, %cst_109 [2] : vector<2x8x8xf32> to vector<2x8xf32>
    %123 = vector.shape_cast %122 : vector<2x8xf32> to vector<2x8x1xf32>
    %124 = tpu.reciprocal %123 {approx = true} : vector<2x8x1xf32> -> vector<2x8x1xf32>
    "tpu.trace_start"() <{level = 10 : i32, message = "bts,bse->bte"}> : () -> ()
    %cst_110 = arith.constant dense<0.000000e+00> : vector<2x8x8xf32>
    %125 = tpu.matmul %121, %113, %cst_110 {dimension_numbers = #tpu.dot_dimension_numbers<[2], [1], [1], [2], [0, 0, 0, 1, 1, 2], [0], [0]>} : vector<2x8x8xf32>, vector<2x8x8xf32>, vector<2x8x8xf32> -> vector<2x8x8xf32>
    "tpu.trace_stop"() : () -> ()
    %126 = vector.broadcast %124 : vector<2x8x1xf32> to vector<2x8x8xf32>
    %127 = arith.mulf %125, %126 : vector<2x8x8xf32>
    %c0_111 = arith.constant 0 : index
    %c2_112 = arith.constant 2 : index
    %c0_113 = arith.constant 0 : index
    %c0_114 = arith.constant 0 : index
    %128 = vector.load %arg8[%c0_111, %c2_112, %c0_113, %c0_114] : memref<2x4x8x32xf32, #tpu.memory_space<vmem>>, vector<1x1x8x32xf32>
    %129 = vector.shape_cast %128 : vector<1x1x8x32xf32> to vector<8x32xf32>
    "tpu.trace_start"() <{level = 10 : i32, message = "bte,ed->btd"}> : () -> ()
    %cst_115 = arith.constant dense<0.000000e+00> : vector<2x8x32xf32>
    %130 = tpu.matmul %127, %129, %cst_115 {dimension_numbers = #tpu.dot_dimension_numbers<[2], [0], [0, 1], [1], [0, 0, 0, 1, 1, 1], [], []>} : vector<2x8x8xf32>, vector<8x32xf32>, vector<2x8x32xf32> -> vector<2x8x32xf32>
    "tpu.trace_stop"() : () -> ()
    %131 = arith.addf %89, %130 : vector<2x8x32xf32>
    %c0_116 = arith.constant 0 : index
    %c3 = arith.constant 3 : index
    %c0_117 = arith.constant 0 : index
    %c0_118 = arith.constant 0 : index
    %132 = vector.load %arg2[%c0_116, %c3, %c0_117, %c0_118] : memref<2x4x32x8xf32, #tpu.memory_space<vmem>>, vector<1x1x32x8xf32>
    %133 = vector.shape_cast %132 : vector<1x1x32x8xf32> to vector<32x8xf32>
    "tpu.trace_start"() <{level = 10 : i32, message = "btd,de->bte"}> : () -> ()
    %cst_119 = arith.constant dense<0.000000e+00> : vector<2x8x8xf32>
    %134 = tpu.matmul %0, %133, %cst_119 {dimension_numbers = #tpu.dot_dimension_numbers<[2], [0], [0, 1], [1], [0, 0, 0, 1, 1, 1], [], []>} : vector<2x8x32xf32>, vector<32x8xf32>, vector<2x8x8xf32> -> vector<2x8x8xf32>
    "tpu.trace_stop"() : () -> ()
    %c0_120 = arith.constant 0 : index
    %c3_121 = arith.constant 3 : index
    %c0_122 = arith.constant 0 : index
    %c0_123 = arith.constant 0 : index
    %135 = vector.load %arg3[%c0_120, %c3_121, %c0_122, %c0_123] : memref<2x4x1x8xf32, #tpu.memory_space<vmem>>, vector<1x1x1x8xf32>
    %136 = vector.shape_cast %135 : vector<1x1x1x8xf32> to vector<1x8xf32>
    %137 = vector.shape_cast %136 : vector<1x8xf32> to vector<1x1x8xf32>
    %138 = vector.broadcast %137 : vector<1x1x8xf32> to vector<2x8x8xf32>
    %139 = arith.addf %134, %138 : vector<2x8x8xf32>
    %c0_124 = arith.constant 0 : index
    %c3_125 = arith.constant 3 : index
    %c0_126 = arith.constant 0 : index
    %c0_127 = arith.constant 0 : index
    %140 = vector.load %arg4[%c0_124, %c3_125, %c0_126, %c0_127] : memref<2x4x32x8xf32, #tpu.memory_space<vmem>>, vector<1x1x32x8xf32>
    %141 = vector.shape_cast %140 : vector<1x1x32x8xf32> to vector<32x8xf32>
    "tpu.trace_start"() <{level = 10 : i32, message = "bsd,de->bse"}> : () -> ()
    %cst_128 = arith.constant dense<0.000000e+00> : vector<2x8x8xf32>
    %142 = tpu.matmul %3, %141, %cst_128 {dimension_numbers = #tpu.dot_dimension_numbers<[2], [0], [0, 1], [1], [0, 0, 0, 1, 1, 1], [], []>} : vector<2x8x32xf32>, vector<32x8xf32>, vector<2x8x8xf32> -> vector<2x8x8xf32>
    "tpu.trace_stop"() : () -> ()
    %c0_129 = arith.constant 0 : index
    %c3_130 = arith.constant 3 : index
    %c0_131 = arith.constant 0 : index
    %c0_132 = arith.constant 0 : index
    %143 = vector.load %arg5[%c0_129, %c3_130, %c0_131, %c0_132] : memref<2x4x1x8xf32, #tpu.memory_space<vmem>>, vector<1x1x1x8xf32>
    %144 = vector.shape_cast %143 : vector<1x1x1x8xf32> to vector<1x8xf32>
    %145 = vector.shape_cast %144 : vector<1x8xf32> to vector<1x1x8xf32>
    %146 = vector.broadcast %145 : vector<1x1x8xf32> to vector<2x8x8xf32>
    %147 = arith.addf %142, %146 : vector<2x8x8xf32>
    %c0_133 = arith.constant 0 : index
    %c3_134 = arith.constant 3 : index
    %c0_135 = arith.constant 0 : index
    %c0_136 = arith.constant 0 : index
    %148 = vector.load %arg6[%c0_133, %c3_134, %c0_135, %c0_136] : memref<2x4x32x8xf32, #tpu.memory_space<vmem>>, vector<1x1x32x8xf32>
    %149 = vector.shape_cast %148 : vector<1x1x32x8xf32> to vector<32x8xf32>
    "tpu.trace_start"() <{level = 10 : i32, message = "bsd,de->bse"}> : () -> ()
    %cst_137 = arith.constant dense<0.000000e+00> : vector<2x8x8xf32>
    %150 = tpu.matmul %3, %149, %cst_137 {dimension_numbers = #tpu.dot_dimension_numbers<[2], [0], [0, 1], [1], [0, 0, 0, 1, 1, 1], [], []>} : vector<2x8x32xf32>, vector<32x8xf32>, vector<2x8x8xf32> -> vector<2x8x8xf32>
    "tpu.trace_stop"() : () -> ()
    %c0_138 = arith.constant 0 : index
    %c3_139 = arith.constant 3 : index
    %c0_140 = arith.constant 0 : index
    %c0_141 = arith.constant 0 : index
    %151 = vector.load %arg7[%c0_138, %c3_139, %c0_140, %c0_141] : memref<2x4x1x8xf32, #tpu.memory_space<vmem>>, vector<1x1x1x8xf32>
    %152 = vector.shape_cast %151 : vector<1x1x1x8xf32> to vector<1x8xf32>
    %153 = vector.shape_cast %152 : vector<1x8xf32> to vector<1x1x8xf32>
    %154 = vector.broadcast %153 : vector<1x1x8xf32> to vector<2x8x8xf32>
    %155 = arith.addf %150, %154 : vector<2x8x8xf32>
    "tpu.trace_start"() <{level = 10 : i32, message = "bte,bse->bts"}> : () -> ()
    %cst_142 = arith.constant dense<0.000000e+00> : vector<2x8x8xf32>
    %156 = tpu.matmul %139, %147, %cst_142 {dimension_numbers = #tpu.dot_dimension_numbers<[2], [2], [1], [1], [0, 0, 0, 1, 1, 1], [0], [0]>} : vector<2x8x8xf32>, vector<2x8x8xf32>, vector<2x8x8xf32> -> vector<2x8x8xf32>
    "tpu.trace_stop"() : () -> ()
    %157 = vector.broadcast %5 : vector<2x1x8xf32> to vector<2x8x8xf32>
    %158 = arith.addf %156, %157 : vector<2x8x8xf32>
    %cst_143 = arith.constant dense<0xFF800000> : vector<2x8xf32>
    %159 = vector.multi_reduction <maximumf>, %158, %cst_143 [2] : vector<2x8x8xf32> to vector<2x8xf32>
    %160 = vector.shape_cast %159 : vector<2x8xf32> to vector<2x8x1xf32>
    %161 = vector.broadcast %160 : vector<2x8x1xf32> to vector<2x8x8xf32>
    %162 = arith.subf %158, %161 : vector<2x8x8xf32>
    %163 = math.exp %162 : vector<2x8x8xf32>
    %cst_144 = arith.constant dense<0.000000e+00> : vector<2x8xf32>
    %164 = vector.multi_reduction <add>, %163, %cst_144 [2] : vector<2x8x8xf32> to vector<2x8xf32>
    %165 = vector.shape_cast %164 : vector<2x8xf32> to vector<2x8x1xf32>
    %166 = tpu.reciprocal %165 {approx = true} : vector<2x8x1xf32> -> vector<2x8x1xf32>
    "tpu.trace_start"() <{level = 10 : i32, message = "bts,bse->bte"}> : () -> ()
    %cst_145 = arith.constant dense<0.000000e+00> : vector<2x8x8xf32>
    %167 = tpu.matmul %163, %155, %cst_145 {dimension_numbers = #tpu.dot_dimension_numbers<[2], [1], [1], [2], [0, 0, 0, 1, 1, 2], [0], [0]>} : vector<2x8x8xf32>, vector<2x8x8xf32>, vector<2x8x8xf32> -> vector<2x8x8xf32>
    "tpu.trace_stop"() : () -> ()
    %168 = vector.broadcast %166 : vector<2x8x1xf32> to vector<2x8x8xf32>
    %169 = arith.mulf %167, %168 : vector<2x8x8xf32>
    %c0_146 = arith.constant 0 : index
    %c3_147 = arith.constant 3 : index
    %c0_148 = arith.constant 0 : index
    %c0_149 = arith.constant 0 : index
    %170 = vector.load %arg8[%c0_146, %c3_147, %c0_148, %c0_149] : memref<2x4x8x32xf32, #tpu.memory_space<vmem>>, vector<1x1x8x32xf32>
    %171 = vector.shape_cast %170 : vector<1x1x8x32xf32> to vector<8x32xf32>
    "tpu.trace_start"() <{level = 10 : i32, message = "bte,ed->btd"}> : () -> ()
    %cst_150 = arith.constant dense<0.000000e+00> : vector<2x8x32xf32>
    %172 = tpu.matmul %169, %171, %cst_150 {dimension_numbers = #tpu.dot_dimension_numbers<[2], [0], [0, 1], [1], [0, 0, 0, 1, 1, 1], [], []>} : vector<2x8x8xf32>, vector<8x32xf32>, vector<2x8x32xf32> -> vector<2x8x32xf32>
    "tpu.trace_stop"() : () -> ()
    %173 = arith.addf %131, %172 : vector<2x8x32xf32>
    %c1_151 = arith.constant 1 : index
    %c0_152 = arith.constant 0 : index
    %c0_153 = arith.constant 0 : index
    %c0_154 = arith.constant 0 : index
    %174 = vector.load %arg1[%c1_151, %c0_152, %c0_153, %c0_154] : memref<2x2x8x32xf32, #tpu.memory_space<vmem>>, vector<1x2x8x32xf32>
    %175 = vector.shape_cast %174 : vector<1x2x8x32xf32> to vector<2x8x32xf32>
    %c1_155 = arith.constant 1 : index
    %c0_156 = arith.constant 0 : index
    %c0_157 = arith.constant 0 : index
    %c0_158 = arith.constant 0 : index
    %176 = vector.load %arg9[%c1_155, %c0_156, %c0_157, %c0_158] : memref<2x2x1x8xf32, #tpu.memory_space<vmem>>, vector<1x2x1x8xf32>
    %177 = vector.shape_cast %176 : vector<1x2x1x8xf32> to vector<2x1x8xf32>
    %c1_159 = arith.constant 1 : index
    %c0_160 = arith.constant 0 : index
    %c0_161 = arith.constant 0 : index
    %c0_162 = arith.constant 0 : index
    %178 = vector.load %arg2[%c1_159, %c0_160, %c0_161, %c0_162] : memref<2x4x32x8xf32, #tpu.memory_space<vmem>>, vector<1x1x32x8xf32>
    %179 = vector.shape_cast %178 : vector<1x1x32x8xf32> to vector<32x8xf32>
    "tpu.trace_start"() <{level = 10 : i32, message = "btd,de->bte"}> : () -> ()
    %cst_163 = arith.constant dense<0.000000e+00> : vector<2x8x8xf32>
    %180 = tpu.matmul %0, %179, %cst_163 {dimension_numbers = #tpu.dot_dimension_numbers<[2], [0], [0, 1], [1], [0, 0, 0, 1, 1, 1], [], []>} : vector<2x8x32xf32>, vector<32x8xf32>, vector<2x8x8xf32> -> vector<2x8x8xf32>
    "tpu.trace_stop"() : () -> ()
    %c1_164 = arith.constant 1 : index
    %c0_165 = arith.constant 0 : index
    %c0_166 = arith.constant 0 : index
    %c0_167 = arith.constant 0 : index
    %181 = vector.load %arg3[%c1_164, %c0_165, %c0_166, %c0_167] : memref<2x4x1x8xf32, #tpu.memory_space<vmem>>, vector<1x1x1x8xf32>
    %182 = vector.shape_cast %181 : vector<1x1x1x8xf32> to vector<1x8xf32>
    %183 = vector.shape_cast %182 : vector<1x8xf32> to vector<1x1x8xf32>
    %184 = vector.broadcast %183 : vector<1x1x8xf32> to vector<2x8x8xf32>
    %185 = arith.addf %180, %184 : vector<2x8x8xf32>
    %c1_168 = arith.constant 1 : index
    %c0_169 = arith.constant 0 : index
    %c0_170 = arith.constant 0 : index
    %c0_171 = arith.constant 0 : index
    %186 = vector.load %arg4[%c1_168, %c0_169, %c0_170, %c0_171] : memref<2x4x32x8xf32, #tpu.memory_space<vmem>>, vector<1x1x32x8xf32>
    %187 = vector.shape_cast %186 : vector<1x1x32x8xf32> to vector<32x8xf32>
    "tpu.trace_start"() <{level = 10 : i32, message = "bsd,de->bse"}> : () -> ()
    %cst_172 = arith.constant dense<0.000000e+00> : vector<2x8x8xf32>
    %188 = tpu.matmul %175, %187, %cst_172 {dimension_numbers = #tpu.dot_dimension_numbers<[2], [0], [0, 1], [1], [0, 0, 0, 1, 1, 1], [], []>} : vector<2x8x32xf32>, vector<32x8xf32>, vector<2x8x8xf32> -> vector<2x8x8xf32>
    "tpu.trace_stop"() : () -> ()
    %c1_173 = arith.constant 1 : index
    %c0_174 = arith.constant 0 : index
    %c0_175 = arith.constant 0 : index
    %c0_176 = arith.constant 0 : index
    %189 = vector.load %arg5[%c1_173, %c0_174, %c0_175, %c0_176] : memref<2x4x1x8xf32, #tpu.memory_space<vmem>>, vector<1x1x1x8xf32>
    %190 = vector.shape_cast %189 : vector<1x1x1x8xf32> to vector<1x8xf32>
    %191 = vector.shape_cast %190 : vector<1x8xf32> to vector<1x1x8xf32>
    %192 = vector.broadcast %191 : vector<1x1x8xf32> to vector<2x8x8xf32>
    %193 = arith.addf %188, %192 : vector<2x8x8xf32>
    %c1_177 = arith.constant 1 : index
    %c0_178 = arith.constant 0 : index
    %c0_179 = arith.constant 0 : index
    %c0_180 = arith.constant 0 : index
    %194 = vector.load %arg6[%c1_177, %c0_178, %c0_179, %c0_180] : memref<2x4x32x8xf32, #tpu.memory_space<vmem>>, vector<1x1x32x8xf32>
    %195 = vector.shape_cast %194 : vector<1x1x32x8xf32> to vector<32x8xf32>
    "tpu.trace_start"() <{level = 10 : i32, message = "bsd,de->bse"}> : () -> ()
    %cst_181 = arith.constant dense<0.000000e+00> : vector<2x8x8xf32>
    %196 = tpu.matmul %175, %195, %cst_181 {dimension_numbers = #tpu.dot_dimension_numbers<[2], [0], [0, 1], [1], [0, 0, 0, 1, 1, 1], [], []>} : vector<2x8x32xf32>, vector<32x8xf32>, vector<2x8x8xf32> -> vector<2x8x8xf32>
    "tpu.trace_stop"() : () -> ()
    %c1_182 = arith.constant 1 : index
    %c0_183 = arith.constant 0 : index
    %c0_184 = arith.constant 0 : index
    %c0_185 = arith.constant 0 : index
    %197 = vector.load %arg7[%c1_182, %c0_183, %c0_184, %c0_185] : memref<2x4x1x8xf32, #tpu.memory_space<vmem>>, vector<1x1x1x8xf32>
    %198 = vector.shape_cast %197 : vector<1x1x1x8xf32> to vector<1x8xf32>
    %199 = vector.shape_cast %198 : vector<1x8xf32> to vector<1x1x8xf32>
    %200 = vector.broadcast %199 : vector<1x1x8xf32> to vector<2x8x8xf32>
    %201 = arith.addf %196, %200 : vector<2x8x8xf32>
    "tpu.trace_start"() <{level = 10 : i32, message = "bte,bse->bts"}> : () -> ()
    %cst_186 = arith.constant dense<0.000000e+00> : vector<2x8x8xf32>
    %202 = tpu.matmul %185, %193, %cst_186 {dimension_numbers = #tpu.dot_dimension_numbers<[2], [2], [1], [1], [0, 0, 0, 1, 1, 1], [0], [0]>} : vector<2x8x8xf32>, vector<2x8x8xf32>, vector<2x8x8xf32> -> vector<2x8x8xf32>
    "tpu.trace_stop"() : () -> ()
    %203 = vector.broadcast %177 : vector<2x1x8xf32> to vector<2x8x8xf32>
    %204 = arith.addf %202, %203 : vector<2x8x8xf32>
    %cst_187 = arith.constant dense<0xFF800000> : vector<2x8xf32>
    %205 = vector.multi_reduction <maximumf>, %204, %cst_187 [2] : vector<2x8x8xf32> to vector<2x8xf32>
    %206 = vector.shape_cast %205 : vector<2x8xf32> to vector<2x8x1xf32>
    %207 = vector.broadcast %206 : vector<2x8x1xf32> to vector<2x8x8xf32>
    %208 = arith.subf %204, %207 : vector<2x8x8xf32>
    %209 = math.exp %208 : vector<2x8x8xf32>
    %cst_188 = arith.constant dense<0.000000e+00> : vector<2x8xf32>
    %210 = vector.multi_reduction <add>, %209, %cst_188 [2] : vector<2x8x8xf32> to vector<2x8xf32>
    %211 = vector.shape_cast %210 : vector<2x8xf32> to vector<2x8x1xf32>
    %212 = tpu.reciprocal %211 {approx = true} : vector<2x8x1xf32> -> vector<2x8x1xf32>
    "tpu.trace_start"() <{level = 10 : i32, message = "bts,bse->bte"}> : () -> ()
    %cst_189 = arith.constant dense<0.000000e+00> : vector<2x8x8xf32>
    %213 = tpu.matmul %209, %201, %cst_189 {dimension_numbers = #tpu.dot_dimension_numbers<[2], [1], [1], [2], [0, 0, 0, 1, 1, 2], [0], [0]>} : vector<2x8x8xf32>, vector<2x8x8xf32>, vector<2x8x8xf32> -> vector<2x8x8xf32>
    "tpu.trace_stop"() : () -> ()
    %214 = vector.broadcast %212 : vector<2x8x1xf32> to vector<2x8x8xf32>
    %215 = arith.mulf %213, %214 : vector<2x8x8xf32>
    %c1_190 = arith.constant 1 : index
    %c0_191 = arith.constant 0 : index
    %c0_192 = arith.constant 0 : index
    %c0_193 = arith.constant 0 : index
    %216 = vector.load %arg8[%c1_190, %c0_191, %c0_192, %c0_193] : memref<2x4x8x32xf32, #tpu.memory_space<vmem>>, vector<1x1x8x32xf32>
    %217 = vector.shape_cast %216 : vector<1x1x8x32xf32> to vector<8x32xf32>
    "tpu.trace_start"() <{level = 10 : i32, message = "bte,ed->btd"}> : () -> ()
    %cst_194 = arith.constant dense<0.000000e+00> : vector<2x8x32xf32>
    %218 = tpu.matmul %215, %217, %cst_194 {dimension_numbers = #tpu.dot_dimension_numbers<[2], [0], [0, 1], [1], [0, 0, 0, 1, 1, 1], [], []>} : vector<2x8x8xf32>, vector<8x32xf32>, vector<2x8x32xf32> -> vector<2x8x32xf32>
    "tpu.trace_stop"() : () -> ()
    %219 = arith.addf %173, %218 : vector<2x8x32xf32>
    %c1_195 = arith.constant 1 : index
    %c1_196 = arith.constant 1 : index
    %c0_197 = arith.constant 0 : index
    %c0_198 = arith.constant 0 : index
    %220 = vector.load %arg2[%c1_195, %c1_196, %c0_197, %c0_198] : memref<2x4x32x8xf32, #tpu.memory_space<vmem>>, vector<1x1x32x8xf32>
    %221 = vector.shape_cast %220 : vector<1x1x32x8xf32> to vector<32x8xf32>
    "tpu.trace_start"() <{level = 10 : i32, message = "btd,de->bte"}> : () -> ()
    %cst_199 = arith.constant dense<0.000000e+00> : vector<2x8x8xf32>
    %222 = tpu.matmul %0, %221, %cst_199 {dimension_numbers = #tpu.dot_dimension_numbers<[2], [0], [0, 1], [1], [0, 0, 0, 1, 1, 1], [], []>} : vector<2x8x32xf32>, vector<32x8xf32>, vector<2x8x8xf32> -> vector<2x8x8xf32>
    "tpu.trace_stop"() : () -> ()
    %c1_200 = arith.constant 1 : index
    %c1_201 = arith.constant 1 : index
    %c0_202 = arith.constant 0 : index
    %c0_203 = arith.constant 0 : index
    %223 = vector.load %arg3[%c1_200, %c1_201, %c0_202, %c0_203] : memref<2x4x1x8xf32, #tpu.memory_space<vmem>>, vector<1x1x1x8xf32>
    %224 = vector.shape_cast %223 : vector<1x1x1x8xf32> to vector<1x8xf32>
    %225 = vector.shape_cast %224 : vector<1x8xf32> to vector<1x1x8xf32>
    %226 = vector.broadcast %225 : vector<1x1x8xf32> to vector<2x8x8xf32>
    %227 = arith.addf %222, %226 : vector<2x8x8xf32>
    %c1_204 = arith.constant 1 : index
    %c1_205 = arith.constant 1 : index
    %c0_206 = arith.constant 0 : index
    %c0_207 = arith.constant 0 : index
    %228 = vector.load %arg4[%c1_204, %c1_205, %c0_206, %c0_207] : memref<2x4x32x8xf32, #tpu.memory_space<vmem>>, vector<1x1x32x8xf32>
    %229 = vector.shape_cast %228 : vector<1x1x32x8xf32> to vector<32x8xf32>
    "tpu.trace_start"() <{level = 10 : i32, message = "bsd,de->bse"}> : () -> ()
    %cst_208 = arith.constant dense<0.000000e+00> : vector<2x8x8xf32>
    %230 = tpu.matmul %175, %229, %cst_208 {dimension_numbers = #tpu.dot_dimension_numbers<[2], [0], [0, 1], [1], [0, 0, 0, 1, 1, 1], [], []>} : vector<2x8x32xf32>, vector<32x8xf32>, vector<2x8x8xf32> -> vector<2x8x8xf32>
    "tpu.trace_stop"() : () -> ()
    %c1_209 = arith.constant 1 : index
    %c1_210 = arith.constant 1 : index
    %c0_211 = arith.constant 0 : index
    %c0_212 = arith.constant 0 : index
    %231 = vector.load %arg5[%c1_209, %c1_210, %c0_211, %c0_212] : memref<2x4x1x8xf32, #tpu.memory_space<vmem>>, vector<1x1x1x8xf32>
    %232 = vector.shape_cast %231 : vector<1x1x1x8xf32> to vector<1x8xf32>
    %233 = vector.shape_cast %232 : vector<1x8xf32> to vector<1x1x8xf32>
    %234 = vector.broadcast %233 : vector<1x1x8xf32> to vector<2x8x8xf32>
    %235 = arith.addf %230, %234 : vector<2x8x8xf32>
    %c1_213 = arith.constant 1 : index
    %c1_214 = arith.constant 1 : index
    %c0_215 = arith.constant 0 : index
    %c0_216 = arith.constant 0 : index
    %236 = vector.load %arg6[%c1_213, %c1_214, %c0_215, %c0_216] : memref<2x4x32x8xf32, #tpu.memory_space<vmem>>, vector<1x1x32x8xf32>
    %237 = vector.shape_cast %236 : vector<1x1x32x8xf32> to vector<32x8xf32>
    "tpu.trace_start"() <{level = 10 : i32, message = "bsd,de->bse"}> : () -> ()
    %cst_217 = arith.constant dense<0.000000e+00> : vector<2x8x8xf32>
    %238 = tpu.matmul %175, %237, %cst_217 {dimension_numbers = #tpu.dot_dimension_numbers<[2], [0], [0, 1], [1], [0, 0, 0, 1, 1, 1], [], []>} : vector<2x8x32xf32>, vector<32x8xf32>, vector<2x8x8xf32> -> vector<2x8x8xf32>
    "tpu.trace_stop"() : () -> ()
    %c1_218 = arith.constant 1 : index
    %c1_219 = arith.constant 1 : index
    %c0_220 = arith.constant 0 : index
    %c0_221 = arith.constant 0 : index
    %239 = vector.load %arg7[%c1_218, %c1_219, %c0_220, %c0_221] : memref<2x4x1x8xf32, #tpu.memory_space<vmem>>, vector<1x1x1x8xf32>
    %240 = vector.shape_cast %239 : vector<1x1x1x8xf32> to vector<1x8xf32>
    %241 = vector.shape_cast %240 : vector<1x8xf32> to vector<1x1x8xf32>
    %242 = vector.broadcast %241 : vector<1x1x8xf32> to vector<2x8x8xf32>
    %243 = arith.addf %238, %242 : vector<2x8x8xf32>
    "tpu.trace_start"() <{level = 10 : i32, message = "bte,bse->bts"}> : () -> ()
    %cst_222 = arith.constant dense<0.000000e+00> : vector<2x8x8xf32>
    %244 = tpu.matmul %227, %235, %cst_222 {dimension_numbers = #tpu.dot_dimension_numbers<[2], [2], [1], [1], [0, 0, 0, 1, 1, 1], [0], [0]>} : vector<2x8x8xf32>, vector<2x8x8xf32>, vector<2x8x8xf32> -> vector<2x8x8xf32>
    "tpu.trace_stop"() : () -> ()
    %245 = vector.broadcast %177 : vector<2x1x8xf32> to vector<2x8x8xf32>
    %246 = arith.addf %244, %245 : vector<2x8x8xf32>
    %cst_223 = arith.constant dense<0xFF800000> : vector<2x8xf32>
    %247 = vector.multi_reduction <maximumf>, %246, %cst_223 [2] : vector<2x8x8xf32> to vector<2x8xf32>
    %248 = vector.shape_cast %247 : vector<2x8xf32> to vector<2x8x1xf32>
    %249 = vector.broadcast %248 : vector<2x8x1xf32> to vector<2x8x8xf32>
    %250 = arith.subf %246, %249 : vector<2x8x8xf32>
    %251 = math.exp %250 : vector<2x8x8xf32>
    %cst_224 = arith.constant dense<0.000000e+00> : vector<2x8xf32>
    %252 = vector.multi_reduction <add>, %251, %cst_224 [2] : vector<2x8x8xf32> to vector<2x8xf32>
    %253 = vector.shape_cast %252 : vector<2x8xf32> to vector<2x8x1xf32>
    %254 = tpu.reciprocal %253 {approx = true} : vector<2x8x1xf32> -> vector<2x8x1xf32>
    "tpu.trace_start"() <{level = 10 : i32, message = "bts,bse->bte"}> : () -> ()
    %cst_225 = arith.constant dense<0.000000e+00> : vector<2x8x8xf32>
    %255 = tpu.matmul %251, %243, %cst_225 {dimension_numbers = #tpu.dot_dimension_numbers<[2], [1], [1], [2], [0, 0, 0, 1, 1, 2], [0], [0]>} : vector<2x8x8xf32>, vector<2x8x8xf32>, vector<2x8x8xf32> -> vector<2x8x8xf32>
    "tpu.trace_stop"() : () -> ()
    %256 = vector.broadcast %254 : vector<2x8x1xf32> to vector<2x8x8xf32>
    %257 = arith.mulf %255, %256 : vector<2x8x8xf32>
    %c1_226 = arith.constant 1 : index
    %c1_227 = arith.constant 1 : index
    %c0_228 = arith.constant 0 : index
    %c0_229 = arith.constant 0 : index
    %258 = vector.load %arg8[%c1_226, %c1_227, %c0_228, %c0_229] : memref<2x4x8x32xf32, #tpu.memory_space<vmem>>, vector<1x1x8x32xf32>
    %259 = vector.shape_cast %258 : vector<1x1x8x32xf32> to vector<8x32xf32>
    "tpu.trace_start"() <{level = 10 : i32, message = "bte,ed->btd"}> : () -> ()
    %cst_230 = arith.constant dense<0.000000e+00> : vector<2x8x32xf32>
    %260 = tpu.matmul %257, %259, %cst_230 {dimension_numbers = #tpu.dot_dimension_numbers<[2], [0], [0, 1], [1], [0, 0, 0, 1, 1, 1], [], []>} : vector<2x8x8xf32>, vector<8x32xf32>, vector<2x8x32xf32> -> vector<2x8x32xf32>
    "tpu.trace_stop"() : () -> ()
    %261 = arith.addf %219, %260 : vector<2x8x32xf32>
    %c1_231 = arith.constant 1 : index
    %c2_232 = arith.constant 2 : index
    %c0_233 = arith.constant 0 : index
    %c0_234 = arith.constant 0 : index
    %262 = vector.load %arg2[%c1_231, %c2_232, %c0_233, %c0_234] : memref<2x4x32x8xf32, #tpu.memory_space<vmem>>, vector<1x1x32x8xf32>
    %263 = vector.shape_cast %262 : vector<1x1x32x8xf32> to vector<32x8xf32>
    "tpu.trace_start"() <{level = 10 : i32, message = "btd,de->bte"}> : () -> ()
    %cst_235 = arith.constant dense<0.000000e+00> : vector<2x8x8xf32>
    %264 = tpu.matmul %0, %263, %cst_235 {dimension_numbers = #tpu.dot_dimension_numbers<[2], [0], [0, 1], [1], [0, 0, 0, 1, 1, 1], [], []>} : vector<2x8x32xf32>, vector<32x8xf32>, vector<2x8x8xf32> -> vector<2x8x8xf32>
    "tpu.trace_stop"() : () -> ()
    %c1_236 = arith.constant 1 : index
    %c2_237 = arith.constant 2 : index
    %c0_238 = arith.constant 0 : index
    %c0_239 = arith.constant 0 : index
    %265 = vector.load %arg3[%c1_236, %c2_237, %c0_238, %c0_239] : memref<2x4x1x8xf32, #tpu.memory_space<vmem>>, vector<1x1x1x8xf32>
    %266 = vector.shape_cast %265 : vector<1x1x1x8xf32> to vector<1x8xf32>
    %267 = vector.shape_cast %266 : vector<1x8xf32> to vector<1x1x8xf32>
    %268 = vector.broadcast %267 : vector<1x1x8xf32> to vector<2x8x8xf32>
    %269 = arith.addf %264, %268 : vector<2x8x8xf32>
    %c1_240 = arith.constant 1 : index
    %c2_241 = arith.constant 2 : index
    %c0_242 = arith.constant 0 : index
    %c0_243 = arith.constant 0 : index
    %270 = vector.load %arg4[%c1_240, %c2_241, %c0_242, %c0_243] : memref<2x4x32x8xf32, #tpu.memory_space<vmem>>, vector<1x1x32x8xf32>
    %271 = vector.shape_cast %270 : vector<1x1x32x8xf32> to vector<32x8xf32>
    "tpu.trace_start"() <{level = 10 : i32, message = "bsd,de->bse"}> : () -> ()
    %cst_244 = arith.constant dense<0.000000e+00> : vector<2x8x8xf32>
    %272 = tpu.matmul %175, %271, %cst_244 {dimension_numbers = #tpu.dot_dimension_numbers<[2], [0], [0, 1], [1], [0, 0, 0, 1, 1, 1], [], []>} : vector<2x8x32xf32>, vector<32x8xf32>, vector<2x8x8xf32> -> vector<2x8x8xf32>
    "tpu.trace_stop"() : () -> ()
    %c1_245 = arith.constant 1 : index
    %c2_246 = arith.constant 2 : index
    %c0_247 = arith.constant 0 : index
    %c0_248 = arith.constant 0 : index
    %273 = vector.load %arg5[%c1_245, %c2_246, %c0_247, %c0_248] : memref<2x4x1x8xf32, #tpu.memory_space<vmem>>, vector<1x1x1x8xf32>
    %274 = vector.shape_cast %273 : vector<1x1x1x8xf32> to vector<1x8xf32>
    %275 = vector.shape_cast %274 : vector<1x8xf32> to vector<1x1x8xf32>
    %276 = vector.broadcast %275 : vector<1x1x8xf32> to vector<2x8x8xf32>
    %277 = arith.addf %272, %276 : vector<2x8x8xf32>
    %c1_249 = arith.constant 1 : index
    %c2_250 = arith.constant 2 : index
    %c0_251 = arith.constant 0 : index
    %c0_252 = arith.constant 0 : index
    %278 = vector.load %arg6[%c1_249, %c2_250, %c0_251, %c0_252] : memref<2x4x32x8xf32, #tpu.memory_space<vmem>>, vector<1x1x32x8xf32>
    %279 = vector.shape_cast %278 : vector<1x1x32x8xf32> to vector<32x8xf32>
    "tpu.trace_start"() <{level = 10 : i32, message = "bsd,de->bse"}> : () -> ()
    %cst_253 = arith.constant dense<0.000000e+00> : vector<2x8x8xf32>
    %280 = tpu.matmul %175, %279, %cst_253 {dimension_numbers = #tpu.dot_dimension_numbers<[2], [0], [0, 1], [1], [0, 0, 0, 1, 1, 1], [], []>} : vector<2x8x32xf32>, vector<32x8xf32>, vector<2x8x8xf32> -> vector<2x8x8xf32>
    "tpu.trace_stop"() : () -> ()
    %c1_254 = arith.constant 1 : index
    %c2_255 = arith.constant 2 : index
    %c0_256 = arith.constant 0 : index
    %c0_257 = arith.constant 0 : index
    %281 = vector.load %arg7[%c1_254, %c2_255, %c0_256, %c0_257] : memref<2x4x1x8xf32, #tpu.memory_space<vmem>>, vector<1x1x1x8xf32>
    %282 = vector.shape_cast %281 : vector<1x1x1x8xf32> to vector<1x8xf32>
    %283 = vector.shape_cast %282 : vector<1x8xf32> to vector<1x1x8xf32>
    %284 = vector.broadcast %283 : vector<1x1x8xf32> to vector<2x8x8xf32>
    %285 = arith.addf %280, %284 : vector<2x8x8xf32>
    "tpu.trace_start"() <{level = 10 : i32, message = "bte,bse->bts"}> : () -> ()
    %cst_258 = arith.constant dense<0.000000e+00> : vector<2x8x8xf32>
    %286 = tpu.matmul %269, %277, %cst_258 {dimension_numbers = #tpu.dot_dimension_numbers<[2], [2], [1], [1], [0, 0, 0, 1, 1, 1], [0], [0]>} : vector<2x8x8xf32>, vector<2x8x8xf32>, vector<2x8x8xf32> -> vector<2x8x8xf32>
    "tpu.trace_stop"() : () -> ()
    %287 = vector.broadcast %177 : vector<2x1x8xf32> to vector<2x8x8xf32>
    %288 = arith.addf %286, %287 : vector<2x8x8xf32>
    %cst_259 = arith.constant dense<0xFF800000> : vector<2x8xf32>
    %289 = vector.multi_reduction <maximumf>, %288, %cst_259 [2] : vector<2x8x8xf32> to vector<2x8xf32>
    %290 = vector.shape_cast %289 : vector<2x8xf32> to vector<2x8x1xf32>
    %291 = vector.broadcast %290 : vector<2x8x1xf32> to vector<2x8x8xf32>
    %292 = arith.subf %288, %291 : vector<2x8x8xf32>
    %293 = math.exp %292 : vector<2x8x8xf32>
    %cst_260 = arith.constant dense<0.000000e+00> : vector<2x8xf32>
    %294 = vector.multi_reduction <add>, %293, %cst_260 [2] : vector<2x8x8xf32> to vector<2x8xf32>
    %295 = vector.shape_cast %294 : vector<2x8xf32> to vector<2x8x1xf32>
    %296 = tpu.reciprocal %295 {approx = true} : vector<2x8x1xf32> -> vector<2x8x1xf32>
    "tpu.trace_start"() <{level = 10 : i32, message = "bts,bse->bte"}> : () -> ()
    %cst_261 = arith.constant dense<0.000000e+00> : vector<2x8x8xf32>
    %297 = tpu.matmul %293, %285, %cst_261 {dimension_numbers = #tpu.dot_dimension_numbers<[2], [1], [1], [2], [0, 0, 0, 1, 1, 2], [0], [0]>} : vector<2x8x8xf32>, vector<2x8x8xf32>, vector<2x8x8xf32> -> vector<2x8x8xf32>
    "tpu.trace_stop"() : () -> ()
    %298 = vector.broadcast %296 : vector<2x8x1xf32> to vector<2x8x8xf32>
    %299 = arith.mulf %297, %298 : vector<2x8x8xf32>
    %c1_262 = arith.constant 1 : index
    %c2_263 = arith.constant 2 : index
    %c0_264 = arith.constant 0 : index
    %c0_265 = arith.constant 0 : index
    %300 = vector.load %arg8[%c1_262, %c2_263, %c0_264, %c0_265] : memref<2x4x8x32xf32, #tpu.memory_space<vmem>>, vector<1x1x8x32xf32>
    %301 = vector.shape_cast %300 : vector<1x1x8x32xf32> to vector<8x32xf32>
    "tpu.trace_start"() <{level = 10 : i32, message = "bte,ed->btd"}> : () -> ()
    %cst_266 = arith.constant dense<0.000000e+00> : vector<2x8x32xf32>
    %302 = tpu.matmul %299, %301, %cst_266 {dimension_numbers = #tpu.dot_dimension_numbers<[2], [0], [0, 1], [1], [0, 0, 0, 1, 1, 1], [], []>} : vector<2x8x8xf32>, vector<8x32xf32>, vector<2x8x32xf32> -> vector<2x8x32xf32>
    "tpu.trace_stop"() : () -> ()
    %303 = arith.addf %261, %302 : vector<2x8x32xf32>
    %c1_267 = arith.constant 1 : index
    %c3_268 = arith.constant 3 : index
    %c0_269 = arith.constant 0 : index
    %c0_270 = arith.constant 0 : index
    %304 = vector.load %arg2[%c1_267, %c3_268, %c0_269, %c0_270] : memref<2x4x32x8xf32, #tpu.memory_space<vmem>>, vector<1x1x32x8xf32>
    %305 = vector.shape_cast %304 : vector<1x1x32x8xf32> to vector<32x8xf32>
    "tpu.trace_start"() <{level = 10 : i32, message = "btd,de->bte"}> : () -> ()
    %cst_271 = arith.constant dense<0.000000e+00> : vector<2x8x8xf32>
    %306 = tpu.matmul %0, %305, %cst_271 {dimension_numbers = #tpu.dot_dimension_numbers<[2], [0], [0, 1], [1], [0, 0, 0, 1, 1, 1], [], []>} : vector<2x8x32xf32>, vector<32x8xf32>, vector<2x8x8xf32> -> vector<2x8x8xf32>
    "tpu.trace_stop"() : () -> ()
    %c1_272 = arith.constant 1 : index
    %c3_273 = arith.constant 3 : index
    %c0_274 = arith.constant 0 : index
    %c0_275 = arith.constant 0 : index
    %307 = vector.load %arg3[%c1_272, %c3_273, %c0_274, %c0_275] : memref<2x4x1x8xf32, #tpu.memory_space<vmem>>, vector<1x1x1x8xf32>
    %308 = vector.shape_cast %307 : vector<1x1x1x8xf32> to vector<1x8xf32>
    %309 = vector.shape_cast %308 : vector<1x8xf32> to vector<1x1x8xf32>
    %310 = vector.broadcast %309 : vector<1x1x8xf32> to vector<2x8x8xf32>
    %311 = arith.addf %306, %310 : vector<2x8x8xf32>
    %c1_276 = arith.constant 1 : index
    %c3_277 = arith.constant 3 : index
    %c0_278 = arith.constant 0 : index
    %c0_279 = arith.constant 0 : index
    %312 = vector.load %arg4[%c1_276, %c3_277, %c0_278, %c0_279] : memref<2x4x32x8xf32, #tpu.memory_space<vmem>>, vector<1x1x32x8xf32>
    %313 = vector.shape_cast %312 : vector<1x1x32x8xf32> to vector<32x8xf32>
    "tpu.trace_start"() <{level = 10 : i32, message = "bsd,de->bse"}> : () -> ()
    %cst_280 = arith.constant dense<0.000000e+00> : vector<2x8x8xf32>
    %314 = tpu.matmul %175, %313, %cst_280 {dimension_numbers = #tpu.dot_dimension_numbers<[2], [0], [0, 1], [1], [0, 0, 0, 1, 1, 1], [], []>} : vector<2x8x32xf32>, vector<32x8xf32>, vector<2x8x8xf32> -> vector<2x8x8xf32>
    "tpu.trace_stop"() : () -> ()
    %c1_281 = arith.constant 1 : index
    %c3_282 = arith.constant 3 : index
    %c0_283 = arith.constant 0 : index
    %c0_284 = arith.constant 0 : index
    %315 = vector.load %arg5[%c1_281, %c3_282, %c0_283, %c0_284] : memref<2x4x1x8xf32, #tpu.memory_space<vmem>>, vector<1x1x1x8xf32>
    %316 = vector.shape_cast %315 : vector<1x1x1x8xf32> to vector<1x8xf32>
    %317 = vector.shape_cast %316 : vector<1x8xf32> to vector<1x1x8xf32>
    %318 = vector.broadcast %317 : vector<1x1x8xf32> to vector<2x8x8xf32>
    %319 = arith.addf %314, %318 : vector<2x8x8xf32>
    %c1_285 = arith.constant 1 : index
    %c3_286 = arith.constant 3 : index
    %c0_287 = arith.constant 0 : index
    %c0_288 = arith.constant 0 : index
    %320 = vector.load %arg6[%c1_285, %c3_286, %c0_287, %c0_288] : memref<2x4x32x8xf32, #tpu.memory_space<vmem>>, vector<1x1x32x8xf32>
    %321 = vector.shape_cast %320 : vector<1x1x32x8xf32> to vector<32x8xf32>
    "tpu.trace_start"() <{level = 10 : i32, message = "bsd,de->bse"}> : () -> ()
    %cst_289 = arith.constant dense<0.000000e+00> : vector<2x8x8xf32>
    %322 = tpu.matmul %175, %321, %cst_289 {dimension_numbers = #tpu.dot_dimension_numbers<[2], [0], [0, 1], [1], [0, 0, 0, 1, 1, 1], [], []>} : vector<2x8x32xf32>, vector<32x8xf32>, vector<2x8x8xf32> -> vector<2x8x8xf32>
    "tpu.trace_stop"() : () -> ()
    %c1_290 = arith.constant 1 : index
    %c3_291 = arith.constant 3 : index
    %c0_292 = arith.constant 0 : index
    %c0_293 = arith.constant 0 : index
    %323 = vector.load %arg7[%c1_290, %c3_291, %c0_292, %c0_293] : memref<2x4x1x8xf32, #tpu.memory_space<vmem>>, vector<1x1x1x8xf32>
    %324 = vector.shape_cast %323 : vector<1x1x1x8xf32> to vector<1x8xf32>
    %325 = vector.shape_cast %324 : vector<1x8xf32> to vector<1x1x8xf32>
    %326 = vector.broadcast %325 : vector<1x1x8xf32> to vector<2x8x8xf32>
    %327 = arith.addf %322, %326 : vector<2x8x8xf32>
    "tpu.trace_start"() <{level = 10 : i32, message = "bte,bse->bts"}> : () -> ()
    %cst_294 = arith.constant dense<0.000000e+00> : vector<2x8x8xf32>
    %328 = tpu.matmul %311, %319, %cst_294 {dimension_numbers = #tpu.dot_dimension_numbers<[2], [2], [1], [1], [0, 0, 0, 1, 1, 1], [0], [0]>} : vector<2x8x8xf32>, vector<2x8x8xf32>, vector<2x8x8xf32> -> vector<2x8x8xf32>
    "tpu.trace_stop"() : () -> ()
    %329 = vector.broadcast %177 : vector<2x1x8xf32> to vector<2x8x8xf32>
    %330 = arith.addf %328, %329 : vector<2x8x8xf32>
    %cst_295 = arith.constant dense<0xFF800000> : vector<2x8xf32>
    %331 = vector.multi_reduction <maximumf>, %330, %cst_295 [2] : vector<2x8x8xf32> to vector<2x8xf32>
    %332 = vector.shape_cast %331 : vector<2x8xf32> to vector<2x8x1xf32>
    %333 = vector.broadcast %332 : vector<2x8x1xf32> to vector<2x8x8xf32>
    %334 = arith.subf %330, %333 : vector<2x8x8xf32>
    %335 = math.exp %334 : vector<2x8x8xf32>
    %cst_296 = arith.constant dense<0.000000e+00> : vector<2x8xf32>
    %336 = vector.multi_reduction <add>, %335, %cst_296 [2] : vector<2x8x8xf32> to vector<2x8xf32>
    %337 = vector.shape_cast %336 : vector<2x8xf32> to vector<2x8x1xf32>
    %338 = tpu.reciprocal %337 {approx = true} : vector<2x8x1xf32> -> vector<2x8x1xf32>
    "tpu.trace_start"() <{level = 10 : i32, message = "bts,bse->bte"}> : () -> ()
    %cst_297 = arith.constant dense<0.000000e+00> : vector<2x8x8xf32>
    %339 = tpu.matmul %335, %327, %cst_297 {dimension_numbers = #tpu.dot_dimension_numbers<[2], [1], [1], [2], [0, 0, 0, 1, 1, 2], [0], [0]>} : vector<2x8x8xf32>, vector<2x8x8xf32>, vector<2x8x8xf32> -> vector<2x8x8xf32>
    "tpu.trace_stop"() : () -> ()
    %340 = vector.broadcast %338 : vector<2x8x1xf32> to vector<2x8x8xf32>
    %341 = arith.mulf %339, %340 : vector<2x8x8xf32>
    %c1_298 = arith.constant 1 : index
    %c3_299 = arith.constant 3 : index
    %c0_300 = arith.constant 0 : index
    %c0_301 = arith.constant 0 : index
    %342 = vector.load %arg8[%c1_298, %c3_299, %c0_300, %c0_301] : memref<2x4x8x32xf32, #tpu.memory_space<vmem>>, vector<1x1x8x32xf32>
    %343 = vector.shape_cast %342 : vector<1x1x8x32xf32> to vector<8x32xf32>
    "tpu.trace_start"() <{level = 10 : i32, message = "bte,ed->btd"}> : () -> ()
    %cst_302 = arith.constant dense<0.000000e+00> : vector<2x8x32xf32>
    %344 = tpu.matmul %341, %343, %cst_302 {dimension_numbers = #tpu.dot_dimension_numbers<[2], [0], [0, 1], [1], [0, 0, 0, 1, 1, 1], [], []>} : vector<2x8x8xf32>, vector<8x32xf32>, vector<2x8x32xf32> -> vector<2x8x32xf32>
    "tpu.trace_stop"() : () -> ()
    %345 = arith.addf %303, %344 : vector<2x8x32xf32>
    %c0_303 = arith.constant 0 : index
    %c0_304 = arith.constant 0 : index
    %c0_305 = arith.constant 0 : index
    %346 = vector.load %arg10[%c0_303, %c0_304, %c0_305] : memref<1x1x32xf32, #tpu.memory_space<vmem>>, vector<1x1x32xf32>
    %347 = vector.broadcast %346 : vector<1x1x32xf32> to vector<2x8x32xf32>
    %348 = arith.addf %345, %347 : vector<2x8x32xf32>
    %349 = arith.addf %0, %348 : vector<2x8x32xf32>
    %cst_306 = arith.constant dense<0.000000e+00> : vector<2x8xf32>
    %350 = vector.multi_reduction <add>, %349, %cst_306 [2] : vector<2x8x32xf32> to vector<2x8xf32>
    %351 = vector.shape_cast %350 : vector<2x8xf32> to vector<2x8x1xf32>
    %cst_307 = arith.constant 3.200000e+01 : f32
    %352 = vector.broadcast %cst_307 : f32 to vector<2x8x1xf32>
    %353 = arith.divf %351, %352 : vector<2x8x1xf32>
    %354 = vector.broadcast %353 : vector<2x8x1xf32> to vector<2x8x32xf32>
    %355 = arith.subf %349, %354 : vector<2x8x32xf32>
    %356 = arith.mulf %355, %355 : vector<2x8x32xf32>
    %cst_308 = arith.constant dense<0.000000e+00> : vector<2x8xf32>
    %357 = vector.multi_reduction <add>, %356, %cst_308 [2] : vector<2x8x32xf32> to vector<2x8xf32>
    %358 = vector.shape_cast %357 : vector<2x8xf32> to vector<2x8x1xf32>
    %cst_309 = arith.constant 3.200000e+01 : f32
    %359 = vector.broadcast %cst_309 : f32 to vector<2x8x1xf32>
    %360 = arith.divf %358, %359 : vector<2x8x1xf32>
    %361 = vector.broadcast %353 : vector<2x8x1xf32> to vector<2x8x32xf32>
    %362 = arith.subf %349, %361 : vector<2x8x32xf32>
    %cst_310 = arith.constant 9.99999974E-6 : f32
    %363 = vector.broadcast %cst_310 : f32 to vector<2x8x1xf32>
    %364 = arith.addf %360, %363 : vector<2x8x1xf32>
    %365 = math.rsqrt %364 : vector<2x8x1xf32>
    %366 = vector.broadcast %365 : vector<2x8x1xf32> to vector<2x8x32xf32>
    %367 = arith.mulf %362, %366 : vector<2x8x32xf32>
    %c0_311 = arith.constant 0 : index
    %c0_312 = arith.constant 0 : index
    %c0_313 = arith.constant 0 : index
    %368 = vector.load %arg11[%c0_311, %c0_312, %c0_313] : memref<1x1x32xf32, #tpu.memory_space<vmem>>, vector<1x1x32xf32>
    %369 = vector.broadcast %368 : vector<1x1x32xf32> to vector<2x8x32xf32>
    %370 = arith.mulf %367, %369 : vector<2x8x32xf32>
    %c0_314 = arith.constant 0 : index
    %c0_315 = arith.constant 0 : index
    %c0_316 = arith.constant 0 : index
    %371 = vector.load %arg12[%c0_314, %c0_315, %c0_316] : memref<1x1x32xf32, #tpu.memory_space<vmem>>, vector<1x1x32xf32>
    %372 = vector.broadcast %371 : vector<1x1x32xf32> to vector<2x8x32xf32>
    %373 = arith.addf %370, %372 : vector<2x8x32xf32>
    %c0_317 = arith.constant 0 : index
    %c0_318 = arith.constant 0 : index
    %c0_319 = arith.constant 0 : index
    %374 = vector.load %arg13[%c0_317, %c0_318, %c0_319] : memref<2x8x32xf32, #tpu.memory_space<vmem>>, vector<2x8x32xf32>
    tpu.vector_store %arg13[%c0_317, %c0_318, %c0_319], %373 {strides = array<i32>} : memref<2x8x32xf32, #tpu.memory_space<vmem>>, vector<2x8x32xf32>,
    return
  }
}

</mosaic_0001>

<bundles_post_ra>
// kernel: tpu_custom_call.1
= control target key start
LH: loop header
LB: loop body
LE: loop exit
PB: predicated region body
PF: predicated region fallthrough
CT: control target
= control target key end

     0   :  { %vm59_vm0 = vcmask 261120   ;;  %s3332_s0 = inlined_call_operand.vmem [shape: f32[2,8,32], index: 0, kind: input, shape index: {}]   ;;  %s3333_s1 = inlined_call_operand.vmem [shape: f32[2,2,8,32], index: 1, kind: input, shape index: {}]   ;;  %s3334_s2 = inlined_call_operand.vmem [shape: f32[2,4,32,8], index: 2, kind: input, shape index: {}]   ;;  %s3335_s3 = inlined_call_operand.vmem [shape: f32[2,4,1,8], index: 3, kind: input, shape index: {}]   ;;  %s3336_s4 = inlined_call_operand.vmem [shape: f32[2,4,32,8], index: 4, kind: input, shape index: {}]   ;;  %s3337_s5 = inlined_call_operand.vmem [shape: f32[2,4,1,8], index: 5, kind: input, shape index: {}]   ;;  %s3338_s6 = inlined_call_operand.vmem [shape: f32[2,4,32,8], index: 6, kind: input, shape index: {}]   ;;  %s3339_s7 = inlined_call_operand.vmem [shape: f32[2,4,1,8], index: 7, kind: input, shape index: {}]   ;;  %s3340_s8 = inlined_call_operand.vmem [shape: f32[2,4,8,32], index: 8, kind: input, shape index: {}]   ;;  %s3341_s9 = inlined_call_operand.vmem [shape: f32[2,2,1,8], index: 9, kind: input, shape index: {}]   ;;  %s3342_s10 = inlined_call_operand.vmem [shape: f32[1,1,32], index: 10, kind: input, shape index: {}]   ;;  %s3343_s11 = inlined_call_operand.vmem [shape: f32[1,1,32], index: 11, kind: input, shape index: {}]   ;;  %s3344_s12 = inlined_call_operand.vmem [shape: f32[1,1,32], index: 12, kind: input, shape index: {}]   ;;  %s3345_s13 = inlined_call_operand.hbm [shape: f32[2,8,32], index: 13, kind: output, shape index: {}]  }
   0x1   :  { %v92_v0 = vld [vmem:[%s3336_s4 + $0x18] sm:$0xff]  ;;  %v91_v1 = vld [vmem:[%s3336_s4 + $0x10] sm:$0xff]  ;;  %v90_v4 = vld [vmem:[%s3336_s4 + $0x8] sm:$0xff] }
   0x2   :  { %v54_v2 = vld [vmem:[%s3334_s2 + $0x18] sm:$0xff]  ;;  %115 = vmatpush.msra.mxu1 %v92_v0  ;;  %2413 = vmatpush.msra.mxu2 %v92_v0  ;;  %v53_v3 = vld [vmem:[%s3334_s2 + $0x10] sm:$0xff]  ;;  %v89_v5 = vld [vmem:[%s3336_s4] sm:$0xff] }
   0x3   :  { %78 = vmatpush.msra.mxu0 %v54_v2  ;;  %v52_v6 = vld [vmem:[%s3334_s2 + $0x8] sm:$0xff]  ;;  %v2648_v7 = vld [vmem:[%s3333_s1] sm:$0xff] }
   0x4   :  { %116 = vmatpush.msra.mxu1 %v91_v1  ;;  %2414 = vmatpush.msra.mxu2 %v91_v1  ;;  %v51_v8 = vld [vmem:[%s3334_s2] sm:$0xff]  ;;  %v2656_v9 = vld [vmem:[%s3333_s1 + $0x8] sm:$0xff] }
   0x5   :  { %79 = vmatpush.msra.mxu0 %v53_v3  ;;  %v2661_v10 = vld [vmem:[%s3332_s0] sm:$0xff]  ;;  %v2672_v11 = vld [vmem:[%s3332_s0 + $0x8] sm:$0xff] }
   0x6   :  { %117 = vmatpush.msra.mxu1 %v90_v4  ;;  %2415 = vmatpush.msra.mxu2 %v90_v4 }
   0x7   :  { %80 = vmatpush.msra.mxu0 %v52_v6 }
   0x8   :  { %118 = vmatpush.msra.mxu1 %v89_v5  ;;  %2416 = vmatpush.msra.mxu2 %v89_v5 }
   0x9   :  { %2187 = vmatmul.msk.f32.vlgmr.msra.gmra.mxu1 %vm59_vm0, %v2648_v7  ;;  %81 = vmatpush.msra.mxu0 %v51_v8 }
   0xa   :  { %2188 = vmatmul.msk.f32.vlgmr.msra.gmra.mxu2 %vm59_vm0, %v2656_v9  ;;  %2185 = vmatmul.msk.f32.vlgmr.msra.gmra.mxu0 %vm59_vm0, %v2661_v10 }
   0xb   :  { %18 = vsyncpa [#allocation3], 0  ;;  %v129_v12 = vld [vmem:[%s3338_s6 + $0x18] sm:$0xff]  ;;  %v128_v13 = vld [vmem:[%s3338_s6 + $0x10] sm:$0xff]  ;;  %vm163_vm1 = vcmask 64512   ;;  %s2173_s18 = sshll.u32 %s3345_s13, 4  ;;  %s2174_s18 = int_to_ptr.hbm [resolvable:$true] %s2173_s18 }
   0xc   :  { %146 = vmatpush.msrb.mxu2 %v129_v12  ;;  %v127_v14 = vld [vmem:[%s3338_s6 + $0x8] sm:$0xff]  ;;  %v126_v15 = vld [vmem:[%s3338_s6] sm:$0xff]  ;;  %v2207_v26 = vld [vmem:[%s3336_s4 + $0x38] sm:$0xff] }
   0xd   :  { %v2421_v16 = vld [vmem:[%s3337_s5] ss:$0 sm:$0xff]  ;;  %v2206_v27 = vld [vmem:[%s3336_s4 + $0x30] sm:$0xff]  ;;  %v2205_v28 = vld [vmem:[%s3336_s4 + $0x28] sm:$0xff] }
   0xe   :  { %147 = vmatpush.msrb.mxu2 %v128_v13  ;;  %v2422_v17 = vld [vmem:[%s3335_s3] ss:$0 sm:$0xff]  ;;  %v2200_v30 = vld [vmem:[%s3334_s2 + $0x38] sm:$0xff]  ;;  %v2199_v31 = vld [vmem:[%s3334_s2 + $0x30] sm:$0xff] }
   0xf   :  { %v2204_v29 = vld [vmem:[%s3336_s4 + $0x20] sm:$0xff]  ;;  %307 = vmatpush.msrb.mxu1 %v2200_v30  ;;  %v2198_v32 = vld [vmem:[%s3334_s2 + $0x28] sm:$0xff]  ;;  %v2214_v50 = vld [vmem:[%s3338_s6 + $0x38] sm:$0xff] }
  0x10   :  { %148 = vmatpush.msrb.mxu2 %v127_v14  ;;  %v2197_v33 = vld [vmem:[%s3334_s2 + $0x20] sm:$0xff]  ;;  %v2213_v51 = vld [vmem:[%s3338_s6 + $0x30] sm:$0xff]  ;;  %v2212_v52 = vld [vmem:[%s3338_s6 + $0x28] sm:$0xff] }
  0x11   :  { %308 = vmatpush.msrb.mxu1 %v2199_v31  ;;  %v2425_v34 = vld [vmem:[%s3339_s7] ss:$0 sm:$0xff]  ;;  %v2740_v38 = vld [vmem:[%s3341_s9 + $0x1] ss:$0 sm:$0xff]  ;;  %v2239_v31 = vld [vmem:[%s3336_s4 + $0x58] sm:$0xff] }
  0x12   :  { %2186 = vmatmul.msk.f32.gmra.mxu0 %vm59_vm0, %v2672_v11  ;;  %149 = vmatpush.msrb.mxu2 %v126_v15  ;;  %v2746_v41 = vld [vmem:[%s3341_s9] ss:$0 sm:$0xff]  ;;  %v2426_v47 = vld [vmem:[%s3337_s5 + $0x1] ss:$0 sm:$0xff] }
  0x13   :  { %2189 = vmatmul.msk.f32.vlgmr.msrb.gmra.mxu2 %vm59_vm0, %v2648_v7  ;;  %309 = vmatpush.msrb.mxu1 %v2198_v32  ;;  %v2427_v63 = vld [vmem:[%s3335_s3 + $0x1] ss:$0 sm:$0xff]  ;;  %v2238_v32 = vld [vmem:[%s3336_s4 + $0x50] sm:$0xff] }
  0x14   :  { %340 = vmatpush.msra.mxu2 %v2207_v26  ;;  %v2211_v6 = vld [vmem:[%s3338_s6 + $0x20] sm:$0xff] }
  0x15   :  { %310 = vmatpush.msrb.mxu1 %v2197_v33  ;;  %v284_v8 = vld [vmem:[%s3340_s8] sm:$0xff]  ;;  %v2237_v33 = vld [vmem:[%s3336_s4 + $0x48] sm:$0xff] }
  0x16   :  { %341 = vmatpush.msra.mxu2 %v2206_v27  ;;  %2202 = vmatmul.msk.f32.vlgmr.msrb.gmra.mxu1 %vm59_vm0, %v2661_v10  ;;  %v2428_v26 = vld [vmem:[%s3339_s7 + $0x1] ss:$0 sm:$0xff] }
  0x18   :  { %342 = vmatpush.msra.mxu2 %v2205_v28 }
  0x1a   :  { %343 = vmatpush.msra.mxu2 %v2204_v29 }
  0x1b   :  { %2190 = vmatmul.msk.f32.gmra.mxu2 %vm59_vm0, %v2656_v9 }
  0x1e   :  { %2203 = vmatmul.msk.f32.gmra.mxu1 %vm59_vm0, %v2672_v11 }
  0x23   :  { %2209 = vmatmul.msk.f32.vlgmr.msra.gmra.mxu2 %vm59_vm0, %v2648_v7 }
  0x2b   :  { %2210 = vmatmul.msk.f32.gmra.mxu2 %vm59_vm0, %v2656_v9 }
  0x86   :  { %v120_v18 = vpop.f32.mrf.mxu1 }
  0x87   :  { %v121_v19 = vadd.f32 %v2421_v16, %v120_v18  ;;  %v83_v20 = vpop.f32.mrf.mxu0 }
  0x88   :  { %v84_v21 = vadd.f32 %v2422_v17, %v83_v20 }
  0x89   :  { %2191 = vmatpush.xpose.msk.msra.mxu3 %vm163_vm1, %v121_v19 }
  0x8c   :  { %2192 = vmatmul.msk.f32.vlgmr.msra.gmra.mxu3 %vm163_vm1, %v84_v21 }
  0x8d   :  { %v123_v22 = vpop.f32.mrf.mxu2 }
  0x8e   :  { %v124_v23 = vadd.f32 %v2421_v16, %v123_v22 }
  0x8f   :  { %v86_v24 = vpop.f32.mrf.mxu0 }
  0x90   :  { %v87_v25 = vadd.f32 %v2422_v17, %v86_v24  ;;  %2193 = vmatpush.xpose.msk.msrb.mxu3 %vm163_vm1, %v124_v23 }
  0x93   :  { %v312_v62 = vpop.f32.mrf.mxu1 }
  0x94   :  { %2194 = vmatmul.msk.f32.vlgmr.msrb.gmra.mxu3 %vm163_vm1, %v87_v25  ;;  %v313_v0 = vadd.f32 %v2427_v63, %v312_v62  ;;  %v2429_v62 = vld [vmem:[%s3337_s5 + $0x2] ss:$0 sm:$0xff] }
  0x96   :  { %v151_v35 = vpop.f32.mrf.mxu2 }
  0x97   :  { %v152_v36 = vadd.f32 %v2425_v34, %v151_v35  ;;  %v2232_v35 = vld [vmem:[%s3334_s2 + $0x58] sm:$0xff] }
  0x99   :  { %254 = vmatpush.msra.mxu3 %v152_v36  ;;  %v2231_v36 = vld [vmem:[%s3334_s2 + $0x50] sm:$0xff] }
  0x9b   :  { %373 = vmatpush.msrb.mxu3 %v2214_v50  ;;  %v315_v3 = vpop.f32.mrf.mxu1 }
  0x9c   :  { %v316_v4 = vadd.f32 %v2427_v63, %v315_v3  ;;  %v2430_v63 = vld [vmem:[%s3335_s3 + $0x2] ss:$0 sm:$0xff] }
  0x9d   :  { %374 = vmatpush.msrb.mxu3 %v2213_v51  ;;  %v2224_v51 = vld [vmem:[%s3340_s8 + $0x8] sm:$0xff] }
  0x9e   :  { %v154_v45 = vpop.f32.mrf.mxu2 }
  0x9f   :  { %v155_v46 = vadd.f32 %v2425_v34, %v154_v45  ;;  %375 = vmatpush.msrb.mxu3 %v2212_v52  ;;  %v2236_v34 = vld [vmem:[%s3336_s4 + $0x40] sm:$0xff]  ;;  %v2246_v52 = vld [vmem:[%s3338_s6 + $0x58] sm:$0xff] }
  0xa1   :  { %277 = vmatpush.msrb.mxu0 %v155_v46  ;;  %376 = vmatpush.msrb.mxu3 %v2211_v6 }
  0xa6   :  { %v345_v48 = vpop.f32.mrf.mxu2 }
  0xa7   :  { %v346_v49 = vadd.f32 %v2426_v47, %v345_v48 }
  0xa9   :  { %2218 = vmatpush.xpose.msk.msra.mxu0 %vm163_vm1, %v346_v49 }
  0xae   :  { %v348_v56 = vpop.f32.mrf.mxu2 }
  0xaf   :  { %v349_v59 = vadd.f32 %v2426_v47, %v348_v56  ;;  %v2243_v56 = vld [vmem:[%s3338_s6 + $0x40] sm:$0xff] }
 0x10f   :  { %v187_v37 = vpop.f32.mrf.mxu3 }
 0x110   :  { %v188_v43 = vadd.f32 %v2746_v41, %v187_v37  ;;  %v2230_v37 = vld [vmem:[%s3334_s2 + $0x48] sm:$0xff] }
 0x112   :  { %v216_v44 = vsel %vm163_vm1, %v188_v43, -inf }
 0x117   :  { %v213_v39 = vpop.f32.mrf.mxu3 }
 0x118   :  { %v214_v40 = vadd.f32 %v2740_v38, %v213_v39  ;;  %v2229_v39 = vld [vmem:[%s3334_s2 + $0x40] sm:$0xff] }
 0x11a   :  { %v219_v42 = vsel %vm163_vm1, %v214_v40, -inf }
 0x11b   :  { %220 = vmax.xlane.f32.xlu0 %v219_v42 }
 0x123   :  { %217 = vmax.xlane.f32.xlu0 %v216_v44 }
 0x18e   :  { %v221_v53 = vpop.xlane.xlu0 %220 }
 0x18f   :  { %v223_v54 = vsub.f32 %v214_v40, %v221_v53  ;;  %v2245_v53 = vld [vmem:[%s3338_s6 + $0x50] sm:$0xff] }
 0x191   :  { %v226_v55 = vmul.f32 1.442695, %v223_v54  ;;  %v2244_v54 = vld [vmem:[%s3338_s6 + $0x48] sm:$0xff] }
 0x193   :  { %2452 = vpow2.f32 %v226_v55 }
 0x196   :  { %v218_v57 = vpop.xlane.xlu0 %217 }
 0x197   :  { %v222_v58 = vsub.f32 %v188_v43, %v218_v57 }
 0x199   :  { %v2453_v60 = vpop.eup %2452  ;;  %v224_v61 = vmul.f32 1.442695, %v222_v58 }
 0x19a   :  { %2196 = vmatmul.msk.f32.vlgmr.msrb.gmra.mxu0 %vm163_vm1, %v2453_v60  ;;  %v231_v5 = vsel %vm163_vm1, %v2453_v60, 0.0 }
 0x19b   :  { %2454 = vpow2.f32 %v224_v61  ;;  %2220 = vmatpush.xpose.msk.msrb.mxu0 %vm163_vm1, %v349_v59 }
 0x1a1   :  { %v2455_v1 = vpop.eup %2454 }
 0x1a2   :  { %2195 = vmatmul.msk.f32.vlgmr.msra.gmra.mxu3 %vm163_vm1, %v2455_v1  ;;  %2219 = vmatmul.msk.f32.vlgmr.msra.gmra.mxu0 %vm163_vm1, %v313_v0  ;;  %v228_v2 = vsel %vm163_vm1, %v2455_v1, 0.0 }
 0x1a3   :  { %229 = vadd.xlane.f32.xlu2 %v228_v2  ;;  %556 = vmatpush.msra.mxu0 %v284_v8 }
 0x1a4   :  { %527 = vmatpush.msra.mxu3 %v2224_v51 }
 0x1aa   :  { %2221 = vmatmul.msk.f32.vlgmr.msrb.gmra.mxu0 %vm163_vm1, %v316_v4  ;;  %2216 = vmatmul.msk.f32.vlgmr.msrb.gmra.mxu3 %vm59_vm0, %v2648_v7 }
 0x1ab   :  { %232 = vadd.xlane.f32.xlu2 %v231_v5  ;;  %652 = vmatpush.msrb.mxu3 %v2246_v52 }
 0x1ad   :  { %653 = vmatpush.msrb.mxu3 %v2245_v53 }
 0x1af   :  { %654 = vmatpush.msrb.mxu3 %v2244_v54 }
 0x1b1   :  { %655 = vmatpush.msrb.mxu3 %v2243_v56 }
 0x1b2   :  { %2217 = vmatmul.msk.f32.gmra.mxu3 %vm59_vm0, %v2656_v9 }
 0x216   :  { %v230_v13 = vpop.xlane.xlu2 %229 }
 0x217   :  { %v279_v12 = vpop.f32.mrf.mxu0  ;;  %2456 = vrcp.f32 %v230_v13 }
 0x21d   :  { %v2457_v16 = vpop.eup %2456 }
 0x21e   :  { %v233_v15 = vpop.xlane.xlu2 %232 }
 0x21f   :  { %v407_v14 = vpop.f32.mrf.mxu0  ;;  %2458 = vrcp.f32 %v233_v15 }
 0x220   :  { %v408_v23 = vadd.f32 %v2746_v41, %v407_v14 }
 0x222   :  { %v436_v25 = vsel %vm163_vm1, %v408_v23, -inf }
 0x225   :  { %v256_v17 = vpop.f32.mrf.mxu3  ;;  %v2459_v22 = vpop.eup %2458 }
 0x226   :  { %v282_v18 = vmul.f32 %v2457_v16, %v256_v17  ;;  %v283_v24 = vmul.f32 %v2459_v22, %v279_v12 }
 0x227   :  { %v433_v19 = vpop.f32.mrf.mxu0 }
 0x228   :  { %v434_v20 = vadd.f32 %v2740_v38, %v433_v19  ;;  %2227 = vmatmul.msk.f32.vlgmr.msra.gmra.mxu0 %vm163_vm1, %v282_v18 }
 0x22a   :  { %v439_v21 = vsel %vm163_vm1, %v434_v20, -inf }
 0x22b   :  { %440 = vmax.xlane.f32.xlu1 %v439_v21 }
 0x22d   :  { %v378_v27 = vpop.f32.mrf.mxu3 }
 0x22e   :  { %v379_v28 = vadd.f32 %v2428_v26, %v378_v27  ;;  %v2269_v27 = vld [vmem:[%s3336_s4 + $0x78] sm:$0xff] }
 0x230   :  { %2228 = vmatmul.msk.f32.gmra.mxu0 %vm163_vm1, %v283_v24  ;;  %474 = vmatpush.msra.mxu1 %v379_v28  ;;  %v2431_v24 = vld [vmem:[%s3339_s7 + $0x2] ss:$0 sm:$0xff]  ;;  %v2268_v28 = vld [vmem:[%s3336_s4 + $0x70] sm:$0xff] }
 0x232   :  { %586 = vmatpush.msrb.mxu1 %v2232_v35  ;;  %v2260_v35 = vld [vmem:[%s3334_s2 + $0x68] sm:$0xff] }
 0x233   :  { %437 = vmax.xlane.f32.xlu1 %v436_v25 }
 0x234   :  { %587 = vmatpush.msrb.mxu1 %v2231_v36  ;;  %v2259_v36 = vld [vmem:[%s3334_s2 + $0x60] sm:$0xff] }
 0x235   :  { %v381_v29 = vpop.f32.mrf.mxu3 }
 0x236   :  { %v382_v30 = vadd.f32 %v2428_v26, %v381_v29  ;;  %588 = vmatpush.msrb.mxu1 %v2230_v37  ;;  %v2262_v29 = vld [vmem:[%s3334_s2 + $0x78] sm:$0xff] }
 0x238   :  { %497 = vmatpush.msrb.mxu2 %v382_v30  ;;  %589 = vmatpush.msrb.mxu1 %v2229_v39  ;;  %v2267_v30 = vld [vmem:[%s3336_s4 + $0x68] sm:$0xff] }
 0x23a   :  { %619 = vmatpush.msra.mxu2 %v2239_v31  ;;  %v2261_v31 = vld [vmem:[%s3334_s2 + $0x70] sm:$0xff] }
 0x23c   :  { %620 = vmatpush.msra.mxu2 %v2238_v32 }
 0x23e   :  { %621 = vmatpush.msra.mxu2 %v2237_v33  ;;  %v2266_v33 = vld [vmem:[%s3336_s4 + $0x60] sm:$0xff] }
 0x240   :  { %622 = vmatpush.msra.mxu2 %v2236_v34 }
 0x29e   :  { %v441_v40 = vpop.xlane.xlu1 %440 }
 0x29f   :  { %v443_v42 = vsub.f32 %v434_v20, %v441_v40 }
 0x2a1   :  { %v446_v43 = vmul.f32 1.442695, %v443_v42 }
 0x2a3   :  { %2460 = vpow2.f32 %v446_v43 }
 0x2a5   :  { %v2860_v14 = vpop.f32.mrf.mxu0 }
 0x2a6   :  { %v438_v44 = vpop.xlane.xlu1 %437 }
 0x2a7   :  { %v442_v45 = vsub.f32 %v408_v23, %v438_v44 }
 0x2a9   :  { %v2461_v46 = vpop.eup %2460  ;;  %v444_v47 = vmul.f32 1.442695, %v442_v45 }
 0x2aa   :  { %2223 = vmatmul.msk.f32.vlgmr.msrb.gmra.mxu2 %vm163_vm1, %v2461_v46  ;;  %v451_v48 = vsel %vm163_vm1, %v2461_v46, 0.0 }
 0x2ab   :  { %2462 = vpow2.f32 %v444_v47  ;;  %452 = vadd.xlane.f32.xlu1 %v451_v48 }
 0x2ad   :  { %v2862_v15 = vpop.f32.mrf.mxu0 }
 0x2b1   :  { %v2463_v49 = vpop.eup %2462 }
 0x2b2   :  { %2222 = vmatmul.msk.f32.vlgmr.msra.gmra.mxu1 %vm163_vm1, %v2463_v49  ;;  %2241 = vmatmul.msk.f32.vlgmr.msra.gmra.mxu2 %vm59_vm0, %v2648_v7  ;;  %v448_v50 = vsel %vm163_vm1, %v2463_v49, 0.0  ;;  %v2256_v49 = vld [vmem:[%s3340_s8 + $0x10] sm:$0xff] }
 0x2b3   :  { %449 = vadd.xlane.f32.xlu0 %v448_v50  ;;  %v2432_v50 = vld [vmem:[%s3337_s5 + $0x3] ss:$0 sm:$0xff] }
 0x2ba   :  { %2242 = vmatmul.msk.f32.gmra.mxu2 %vm59_vm0, %v2656_v9  ;;  %2234 = vmatmul.msk.f32.vlgmr.msrb.gmra.mxu1 %vm59_vm0, %v2661_v10 }
 0x2c2   :  { %2235 = vmatmul.msk.f32.gmra.mxu1 %vm59_vm0, %v2672_v11 }
 0x31e   :  { %v453_v58 = vpop.xlane.xlu1 %452 }
 0x326   :  { %v450_v55 = vpop.xlane.xlu0 %449 }
 0x327   :  { %2464 = vrcp.f32 %v450_v55 }
 0x328   :  { %2466 = vrcp.f32 %v453_v58 }
 0x32d   :  { %v499_v57 = vpop.f32.mrf.mxu2  ;;  %v2465_v59 = vpop.eup %2464 }
 0x32e   :  { %v2467_v2 = vpop.eup %2466 }
 0x32f   :  { %v476_v60 = vpop.f32.mrf.mxu1  ;;  %v503_v4 = vmul.f32 %v2467_v2, %v499_v57 }
 0x330   :  { %v502_v61 = vmul.f32 %v2465_v59, %v476_v60 }
 0x332   :  { %2225 = vmatmul.msk.f32.vlgmr.msra.gmra.mxu3 %vm163_vm1, %v502_v61 }
 0x333   :  { %871 = vmatpush.msra.mxu3 %v2269_v27  ;;  %v2301_v27 = vld [vmem:[%s3336_s4 + $0x88] sm:$0xff] }
 0x335   :  { %v624_v0 = vpop.f32.mrf.mxu2  ;;  %872 = vmatpush.msra.mxu3 %v2268_v28 }
 0x336   :  { %v625_v1 = vadd.f32 %v2429_v62, %v624_v0  ;;  %v2433_v0 = vld [vmem:[%s3335_s3 + $0x3] ss:$0 sm:$0xff] }
 0x337   :  { %v591_v3 = vpop.f32.mrf.mxu1  ;;  %873 = vmatpush.msra.mxu3 %v2267_v30  ;;  %v2300_v30 = vld [vmem:[%s3336_s4 + $0x80] sm:$0xff] }
 0x338   :  { %v592_v5 = vadd.f32 %v2430_v63, %v591_v3  ;;  %2250 = vmatpush.xpose.msk.msrb.mxu0 %vm163_vm1, %v625_v1 }
 0x339   :  { %874 = vmatpush.msra.mxu3 %v2266_v33 }
 0x33a   :  { %2226 = vmatmul.msk.f32.gmra.mxu3 %vm163_vm1, %v503_v4  ;;  %v2276_v4 = vld [vmem:[%s3338_s6 + $0x78] sm:$0xff] }
 0x33b   :  { %2251 = vmatmul.msk.f32.vlgmr.msrb.gmra.mxu0 %vm163_vm1, %v592_v5  ;;  %v2275_v5 = vld [vmem:[%s3338_s6 + $0x70] sm:$0xff] }
 0x33d   :  { %v627_v6 = vpop.f32.mrf.mxu2 }
 0x33e   :  { %v628_v8 = vadd.f32 %v2429_v62, %v627_v6  ;;  %v2274_v6 = vld [vmem:[%s3338_s6 + $0x68] sm:$0xff] }
 0x33f   :  { %v594_v12 = vpop.f32.mrf.mxu1 }
 0x340   :  { %v595_v13 = vadd.f32 %v2430_v63, %v594_v12  ;;  %2252 = vmatpush.xpose.msk.msra.mxu1 %vm163_vm1, %v628_v8  ;;  %v2273_v8 = vld [vmem:[%s3338_s6 + $0x60] sm:$0xff] }
 0x342   :  { %2248 = vmatmul.msk.f32.vlgmr.msrb.gmra.mxu3 %vm59_vm0, %v2648_v7 }
 0x343   :  { %2253 = vmatmul.msk.f32.vlgmr.msra.gmra.mxu1 %vm163_vm1, %v595_v13 }
 0x344   :  { %806 = vmatpush.msrb.mxu1 %v2256_v49 }
 0x34a   :  { %2249 = vmatmul.msk.f32.gmra.mxu3 %vm59_vm0, %v2656_v9 }
 0x352   :  { %2271 = vmatmul.msk.f32.vlgmr.msra.gmra.mxu3 %vm59_vm0, %v2648_v7 }
 0x35a   :  { %2272 = vmatmul.msk.f32.gmra.mxu3 %vm59_vm0, %v2656_v9 }
 0x3b5   :  { %v2868_v22 = vpop.f32.mrf.mxu3 }
 0x3b6   :  { %v559_v12 = vadd.f32 %v2860_v14, %v2868_v22 }
 0x3b8   :  { %v686_v16 = vpop.f32.mrf.mxu0 }
 0x3b9   :  { %v687_v17 = vadd.f32 %v2746_v41, %v686_v16 }
 0x3bb   :  { %v715_v18 = vsel %vm163_vm1, %v687_v17, -inf }
 0x3bc   :  { %716 = vmax.xlane.f32.xlu2 %v715_v18 }
 0x3bd   :  { %v2870_v23 = vpop.f32.mrf.mxu3 }
 0x3c0   :  { %v712_v19 = vpop.f32.mrf.mxu1 }
 0x3c1   :  { %v713_v20 = vadd.f32 %v2740_v38, %v712_v19 }
 0x3c3   :  { %v718_v21 = vsel %vm163_vm1, %v713_v20, -inf }
 0x3c4   :  { %719 = vmax.xlane.f32.xlu0 %v718_v21 }
 0x3c5   :  { %v657_v25 = vpop.f32.mrf.mxu3 }
 0x3c6   :  { %v658_v26 = vadd.f32 %v2431_v24, %v657_v25  ;;  %v2302_v25 = vld [vmem:[%s3336_s4 + $0x90] sm:$0xff] }
 0x3c8   :  { %753 = vmatpush.msrb.mxu2 %v658_v26 }
 0x3ca   :  { %838 = vmatpush.msra.mxu2 %v2262_v29  ;;  %v2295_v29 = vld [vmem:[%s3334_s2 + $0x90] sm:$0xff] }
 0x3cc   :  { %839 = vmatpush.msra.mxu2 %v2261_v31  ;;  %v2294_v31 = vld [vmem:[%s3334_s2 + $0x88] sm:$0xff] }
 0x3cd   :  { %v660_v32 = vpop.f32.mrf.mxu3 }
 0x3ce   :  { %v661_v34 = vadd.f32 %v2431_v24, %v660_v32  ;;  %840 = vmatpush.msra.mxu2 %v2260_v35  ;;  %v2293_v32 = vld [vmem:[%s3334_s2 + $0x80] sm:$0xff] }
 0x3d0   :  { %776 = vmatpush.msra.mxu0 %v661_v34  ;;  %841 = vmatpush.msra.mxu2 %v2259_v36 }
 0x3d2   :  { %904 = vmatpush.msrb.mxu0 %v2276_v4  ;;  %v2308_v4 = vld [vmem:[%s3338_s6 + $0x88] sm:$0xff] }
 0x3d4   :  { %905 = vmatpush.msrb.mxu0 %v2275_v5  ;;  %v2307_v5 = vld [vmem:[%s3338_s6 + $0x80] sm:$0xff] }
 0x3d5   :  { %v876_v51 = vpop.f32.mrf.mxu3 }
 0x3d6   :  { %v877_v52 = vadd.f32 %v2432_v50, %v876_v51  ;;  %906 = vmatpush.msrb.mxu0 %v2274_v6 }
 0x3d8   :  { %2280 = vmatpush.xpose.msk.msra.mxu1 %vm163_vm1, %v877_v52  ;;  %907 = vmatpush.msrb.mxu0 %v2273_v8 }
 0x3dd   :  { %v879_v53 = vpop.f32.mrf.mxu3 }
 0x3de   :  { %v880_v54 = vadd.f32 %v2432_v50, %v879_v53  ;;  %v2435_v53 = vld [vmem:[%s3337_s5 + $0x4] ss:$0 sm:$0xff] }
 0x42f   :  { %v717_v37 = vpop.xlane.xlu2 %716 }
 0x430   :  { %v721_v39 = vsub.f32 %v687_v17, %v717_v37  ;;  %v562_v17 = vadd.f32 %v2862_v15, %v2870_v23  ;;  %v2434_v15 = vld [vmem:[%s3339_s7 + $0x3] ss:$0 sm:$0xff] }
 0x432   :  { %v723_v40 = vmul.f32 1.442695, %v721_v39 }
 0x434   :  { %2468 = vpow2.f32 %v723_v40 }
 0x437   :  { %v720_v42 = vpop.xlane.xlu0 %719 }
 0x438   :  { %v722_v43 = vsub.f32 %v713_v20, %v720_v42 }
 0x43a   :  { %v2469_v44 = vpop.eup %2468  ;;  %v725_v45 = vmul.f32 1.442695, %v722_v43 }
 0x43b   :  { %2254 = vmatmul.msk.f32.vlgmr.msrb.gmra.mxu2 %vm163_vm1, %v2469_v44  ;;  %v727_v46 = vsel %vm163_vm1, %v2469_v44, 0.0  ;;  %v2990_v44 = vld [vmem:[%s3333_s1 + $0x10] sm:$0xff] }
 0x43c   :  { %2470 = vpow2.f32 %v725_v45  ;;  %728 = vadd.xlane.f32.xlu1 %v727_v46  ;;  %2282 = vmatpush.xpose.msk.msrb.mxu2 %vm163_vm1, %v880_v54  ;;  %v2999_v46 = vld [vmem:[%s3333_s1 + $0x18] sm:$0xff] }
 0x442   :  { %v2471_v47 = vpop.eup %2470 }
 0x443   :  { %2255 = vmatmul.msk.f32.vlgmr.msra.gmra.mxu0 %vm163_vm1, %v2471_v47  ;;  %2264 = vmatmul.msk.f32.vlgmr.msra.gmra.mxu2 %vm59_vm0, %v2661_v10  ;;  %v730_v48 = vsel %vm163_vm1, %v2471_v47, 0.0  ;;  %v2286_v47 = vld [vmem:[%s3340_s8 + $0x18] sm:$0xff] }
 0x444   :  { %731 = vadd.xlane.f32.xlu2 %v730_v48 }
 0x44b   :  { %2265 = vmatmul.msk.f32.gmra.mxu2 %vm59_vm0, %v2672_v11  ;;  %2278 = vmatmul.msk.f32.vlgmr.msrb.gmra.mxu0 %vm59_vm0, %v2648_v7 }
 0x453   :  { %2279 = vmatmul.msk.f32.gmra.mxu0 %vm59_vm0, %v2656_v9 }
 0x4af   :  { %v729_v55 = vpop.xlane.xlu1 %728 }
 0x4b0   :  { %2472 = vrcp.f32 %v729_v55 }
 0x4b6   :  { %v2473_v57 = vpop.eup %2472 }
 0x4b7   :  { %v732_v56 = vpop.xlane.xlu2 %731 }
 0x4b8   :  { %2474 = vrcp.f32 %v732_v56 }
 0x4be   :  { %v755_v58 = vpop.f32.mrf.mxu2  ;;  %v2475_v61 = vpop.eup %2474 }
 0x4bf   :  { %v781_v59 = vmul.f32 %v2473_v57, %v755_v58 }
 0x4c0   :  { %v778_v60 = vpop.f32.mrf.mxu0 }
 0x4c1   :  { %2257 = vmatmul.msk.f32.vlgmr.msrb.gmra.mxu1 %vm163_vm1, %v781_v59  ;;  %v782_v63 = vmul.f32 %v2475_v61, %v778_v60  ;;  %v2436_v60 = vld [vmem:[%s3335_s3 + $0x4] ss:$0 sm:$0xff] }
 0x4c2   :  { %1058 = vmatpush.msrb.mxu1 %v2286_v47 }
 0x4c6   :  { %v843_v62 = vpop.f32.mrf.mxu2 }
 0x4c7   :  { %v844_v1 = vadd.f32 %v2433_v0, %v843_v62 }
 0x4c8   :  { %v909_v22 = vpop.f32.mrf.mxu0 }
 0x4c9   :  { %2258 = vmatmul.msk.f32.gmra.mxu1 %vm163_vm1, %v782_v63  ;;  %v910_v23 = vadd.f32 %v2434_v15, %v909_v22 }
 0x4cb   :  { %1005 = vmatpush.msrb.mxu3 %v910_v23  ;;  %v2332_v23 = vld [vmem:[%s3336_s4 + $0xb0] sm:$0xff] }
 0x4ce   :  { %v846_v2 = vpop.f32.mrf.mxu2 }
 0x4cf   :  { %v847_v3 = vadd.f32 %v2433_v0, %v846_v2  ;;  %v2310_v2 = vld [vmem:[%s3338_s6 + $0x98] sm:$0xff] }
 0x4d0   :  { %v912_v26 = vpop.f32.mrf.mxu0 }
 0x4d1   :  { %2281 = vmatmul.msk.f32.vlgmr.msra.gmra.mxu1 %vm163_vm1, %v844_v1  ;;  %2283 = vmatmul.msk.f32.vlgmr.msrb.gmra.mxu2 %vm163_vm1, %v847_v3  ;;  %v913_v28 = vadd.f32 %v2434_v15, %v912_v26  ;;  %v2309_v3 = vld [vmem:[%s3338_s6 + $0x90] sm:$0xff]  ;;  %v2333_v15 = vld [vmem:[%s3336_s4 + $0xb8] sm:$0xff] }
 0x4d2   :  { %v2325_v26 = vld [vmem:[%s3334_s2 + $0xb0] sm:$0xff] }
 0x4d3   :  { %1028 = vmatpush.msra.mxu0 %v913_v28  ;;  %v2330_v28 = vld [vmem:[%s3336_s4 + $0xa0] sm:$0xff] }
 0x4d5   :  { %1168 = vmatpush.msrb.mxu0 %v2310_v2 }
 0x4d7   :  { %1169 = vmatpush.msrb.mxu0 %v2309_v3 }
 0x4d9   :  { %1170 = vmatpush.msrb.mxu0 %v2308_v4 }
 0x4db   :  { %1171 = vmatpush.msrb.mxu0 %v2307_v5 }
 0x53e   :  { %v808_v13 = vpop.f32.mrf.mxu1 }
 0x53f   :  { %v2944_v16 = vadd.f32 %v808_v13, %v559_v12 }
 0x546   :  { %v811_v18 = vpop.f32.mrf.mxu1 }
 0x547   :  { %v2948_v19 = vadd.f32 %v811_v18, %v562_v17  ;;  %v3043_v17 = vld [vmem:[%s3341_s9 + $0x2] ss:$0 sm:$0xff] }
 0x54e   :  { %v938_v20 = vpop.f32.mrf.mxu1 }
 0x54f   :  { %v939_v21 = vadd.f32 %v2746_v41, %v938_v20  ;;  %v2303_v41 = vld [vmem:[%s3336_s4 + $0x98] sm:$0xff] }
 0x550   :  { %1135 = vmatpush.msra.mxu3 %v2303_v41  ;;  %v2326_v41 = vld [vmem:[%s3334_s2 + $0xb8] sm:$0xff] }
 0x551   :  { %v967_v7 = vsel %vm163_vm1, %v939_v21, -inf }
 0x552   :  { %968 = vmax.xlane.f32.xlu0 %v967_v7  ;;  %1136 = vmatpush.msra.mxu3 %v2302_v25  ;;  %v2331_v25 = vld [vmem:[%s3336_s4 + $0xa8] sm:$0xff] }
 0x554   :  { %v964_v24 = vpop.f32.mrf.mxu2  ;;  %1137 = vmatpush.msra.mxu3 %v2301_v27 }
 0x555   :  { %v965_v9 = vadd.f32 %v2740_v38, %v964_v24  ;;  %v2296_v38 = vld [vmem:[%s3334_s2 + $0x98] sm:$0xff] }
 0x556   :  { %1096 = vmatpush.msra.mxu2 %v2296_v38  ;;  %1138 = vmatpush.msra.mxu3 %v2300_v30  ;;  %v2323_v30 = vld [vmem:[%s3334_s2 + $0xa0] sm:$0xff] }
 0x557   :  { %v970_v14 = vsel %vm163_vm1, %v965_v9, -inf }
 0x558   :  { %971 = vmax.xlane.f32.xlu1 %v970_v14  ;;  %1097 = vmatpush.msra.mxu2 %v2295_v29  ;;  %v2324_v29 = vld [vmem:[%s3334_s2 + $0xa8] sm:$0xff] }
 0x55a   :  { %1098 = vmatpush.msra.mxu2 %v2294_v31 }
 0x55c   :  { %1099 = vmatpush.msra.mxu2 %v2293_v32 }
 0x55d   :  { %2298 = vmatmul.msk.f32.vlgmr.msra.gmra.mxu2 %vm59_vm0, %v2661_v10 }
 0x565   :  { %2299 = vmatmul.msk.f32.gmra.mxu2 %vm59_vm0, %v2672_v11 }
 0x5c5   :  { %v969_v33 = vpop.xlane.xlu0 %968 }
 0x5c6   :  { %v973_v34 = vsub.f32 %v939_v21, %v969_v33 }
 0x5c8   :  { %v975_v35 = vmul.f32 1.442695, %v973_v34 }
 0x5ca   :  { %2476 = vpow2.f32 %v975_v35 }
 0x5cb   :  { %v972_v36 = vpop.xlane.xlu1 %971 }
 0x5cc   :  { %v974_v37 = vsub.f32 %v965_v9, %v972_v36  ;;  %v2439_v9 = vld [vmem:[%s3339_s7 + $0x4] ss:$0 sm:$0xff] }
 0x5ce   :  { %v977_v39 = vmul.f32 1.442695, %v974_v37 }
 0x5d0   :  { %v2477_v40 = vpop.eup %2476  ;;  %2478 = vpow2.f32 %v977_v39 }
 0x5d1   :  { %2284 = vmatmul.msk.f32.vlgmr.msrb.gmra.mxu3 %vm163_vm1, %v2477_v40  ;;  %v979_v42 = vsel %vm163_vm1, %v2477_v40, 0.0 }
 0x5d2   :  { %980 = vadd.xlane.f32.xlu2 %v979_v42 }
 0x5d6   :  { %v2479_v43 = vpop.eup %2478 }
 0x5d7   :  { %2285 = vmatmul.msk.f32.vlgmr.msra.gmra.mxu0 %vm163_vm1, %v2479_v43  ;;  %v982_v45 = vsel %vm163_vm1, %v2479_v43, 0.0 }
 0x5d8   :  { %983 = vadd.xlane.f32.xlu0 %v982_v45 }
 0x5d9   :  { %2305 = vmatmul.msk.f32.vlgmr.msra.gmra.mxu3 %vm59_vm0, %v2990_v44 }
 0x5df   :  { %2312 = vmatmul.msk.f32.vlgmr.msrb.gmra.mxu0 %vm59_vm0, %v2990_v44 }
 0x5e0   :  { %v1101_v54 = vpop.f32.mrf.mxu2 }
 0x5e1   :  { %2306 = vmatmul.msk.f32.gmra.mxu3 %vm59_vm0, %v2999_v46  ;;  %v1102_v61 = vadd.f32 %v2436_v60, %v1101_v54 }
 0x5e7   :  { %2313 = vmatmul.msk.f32.gmra.mxu0 %vm59_vm0, %v2999_v46 }
 0x5e8   :  { %v1104_v62 = vpop.f32.mrf.mxu2 }
 0x5e9   :  { %v1105_v1 = vadd.f32 %v2436_v60, %v1104_v62  ;;  %v2340_v62 = vld [vmem:[%s3338_s6 + $0xb8] sm:$0xff] }
 0x645   :  { %v981_v48 = vpop.xlane.xlu2 %980 }
 0x646   :  { %2480 = vrcp.f32 %v981_v48 }
 0x64b   :  { %v984_v49 = vpop.xlane.xlu0 %983 }
 0x64c   :  { %v2481_v50 = vpop.eup %2480  ;;  %2482 = vrcp.f32 %v984_v49  ;;  %v2440_v49 = vld [vmem:[%s3337_s5 + $0x5] ss:$0 sm:$0xff] }
 0x652   :  { %v2483_v56 = vpop.eup %2482 }
 0x654   :  { %v1007_v51 = vpop.f32.mrf.mxu3  ;;  %v1030_v55 = vpop.f32.mrf.mxu0 }
 0x655   :  { %v1033_v52 = vmul.f32 %v2481_v50, %v1007_v51  ;;  %v1034_v58 = vmul.f32 %v2483_v56, %v1030_v55  ;;  %v2441_v56 = vld [vmem:[%s3335_s3 + $0x5] ss:$0 sm:$0xff] }
 0x657   :  { %2287 = vmatmul.msk.f32.vlgmr.msrb.gmra.mxu1 %vm163_vm1, %v1033_v52 }
 0x65c   :  { %v1140_v57 = vpop.f32.mrf.mxu3  ;;  %v1173_v14 = vpop.f32.mrf.mxu0 }
 0x65d   :  { %v1141_v59 = vadd.f32 %v2435_v53, %v1140_v57  ;;  %v1174_v22 = vadd.f32 %v2439_v9, %v1173_v14  ;;  %v2356_v14 = vld [vmem:[%s3334_s2 + $0xd8] sm:$0xff] }
 0x65f   :  { %2288 = vmatmul.msk.f32.gmra.mxu1 %vm163_vm1, %v1034_v58  ;;  %1275 = vmatpush.msrb.mxu3 %v1174_v22  ;;  %v2361_v22 = vld [vmem:[%s3336_s4 + $0xc8] sm:$0xff] }
 0x660   :  { %2314 = vmatpush.xpose.msk.msra.mxu1 %vm163_vm1, %v1141_v59 }
 0x661   :  { %1393 = vmatpush.msra.mxu3 %v2333_v15 }
 0x663   :  { %1394 = vmatpush.msra.mxu3 %v2332_v23  ;;  %v2355_v23 = vld [vmem:[%s3334_s2 + $0xd0] sm:$0xff] }
 0x664   :  { %v1143_v63 = vpop.f32.mrf.mxu3  ;;  %v1176_v38 = vpop.f32.mrf.mxu0 }
 0x665   :  { %v1144_v0 = vadd.f32 %v2435_v53, %v1143_v63  ;;  %v1177_v27 = vadd.f32 %v2439_v9, %v1176_v38  ;;  %1395 = vmatpush.msra.mxu3 %v2331_v25  ;;  %v2339_v63 = vld [vmem:[%s3338_s6 + $0xb0] sm:$0xff]  ;;  %v2360_v25 = vld [vmem:[%s3336_s4 + $0xc0] sm:$0xff]  ;;  %v2354_v38 = vld [vmem:[%s3334_s2 + $0xc8] sm:$0xff] }
 0x666   :  { %v2362_v9 = vld [vmem:[%s3336_s4 + $0xd0] sm:$0xff] }
 0x667   :  { %2315 = vmatmul.msk.f32.vlgmr.msra.gmra.mxu1 %vm163_vm1, %v1102_v61  ;;  %2316 = vmatpush.xpose.msk.msrb.mxu2 %vm163_vm1, %v1144_v0  ;;  %v2338_v0 = vld [vmem:[%s3338_s6 + $0xa8] sm:$0xff] }
 0x668   :  { %1298 = vmatpush.msra.mxu0 %v1177_v27  ;;  %1396 = vmatpush.msra.mxu3 %v2330_v28  ;;  %v3164_v27 = vld [vmem:[%s3332_s0] sm:$0xff]  ;;  %v3171_v28 = vld [vmem:[%s3332_s0 + $0x8] sm:$0xff] }
 0x66a   :  { %2317 = vmatmul.msk.f32.vlgmr.msrb.gmra.mxu2 %vm163_vm1, %v1105_v1  ;;  %1426 = vmatpush.msrb.mxu0 %v2340_v62  ;;  %v2337_v1 = vld [vmem:[%s3338_s6 + $0xa0] sm:$0xff]  ;;  %v2368_v62 = vld [vmem:[%s3338_s6 + $0xc8] sm:$0xff] }
 0x66b   :  { %1360 = vmatpush.msra.mxu2 %v2326_v41 }
 0x66c   :  { %1427 = vmatpush.msrb.mxu0 %v2339_v63  ;;  %v2367_v63 = vld [vmem:[%s3338_s6 + $0xc0] sm:$0xff] }
 0x66d   :  { %1361 = vmatpush.msra.mxu2 %v2325_v26  ;;  %v2353_v26 = vld [vmem:[%s3334_s2 + $0xc0] sm:$0xff] }
 0x66e   :  { %1428 = vmatpush.msrb.mxu0 %v2338_v0 }
 0x66f   :  { %1362 = vmatpush.msra.mxu2 %v2324_v29 }
 0x670   :  { %1429 = vmatpush.msrb.mxu0 %v2337_v1 }
 0x671   :  { %1363 = vmatpush.msra.mxu2 %v2323_v30 }
 0x672   :  { %2328 = vmatmul.msk.f32.vlgmr.msra.gmra.mxu2 %vm59_vm0, %v2661_v10 }
 0x67a   :  { %2329 = vmatmul.msk.f32.gmra.mxu2 %vm59_vm0, %v2672_v11  ;;  %v2320_v11 = vld [vmem:[%s3340_s8 + $0x20] sm:$0xff] }
 0x67b   :  { %1328 = vmatpush.msrb.mxu1 %v2320_v11 }
 0x6d4   :  { %v1060_v6 = vpop.f32.mrf.mxu1 }
 0x6d5   :  { %v3035_v8 = vadd.f32 %v1060_v6, %v2944_v16  ;;  %v3050_v16 = vld [vmem:[%s3341_s9 + $0x3] ss:$0 sm:$0xff] }
 0x6dc   :  { %v1063_v12 = vpop.f32.mrf.mxu1 }
 0x6dd   :  { %v3038_v13 = vadd.f32 %v1063_v12, %v2948_v19 }
 0x6e4   :  { %v1208_v18 = vpop.f32.mrf.mxu1 }
 0x6e5   :  { %v1209_v20 = vadd.f32 %v3043_v17, %v1208_v18 }
 0x6e7   :  { %v1237_v21 = vsel %vm163_vm1, %v1209_v20, -inf }
 0x6e8   :  { %1238 = vmax.xlane.f32.xlu1 %v1237_v21 }
 0x6ed   :  { %v1234_v7 = vpop.f32.mrf.mxu2 }
 0x6ee   :  { %v1235_v19 = vadd.f32 %v3050_v16, %v1234_v7 }
 0x6f0   :  { %v1240_v24 = vsel %vm163_vm1, %v1235_v19, -inf }
 0x6f1   :  { %1241 = vmax.xlane.f32.xlu2 %v1240_v24 }
 0x6f5   :  { %v1365_v50 = vpop.f32.mrf.mxu2 }
 0x6f6   :  { %v1366_v57 = vadd.f32 %v2441_v56, %v1365_v50 }
 0x6fd   :  { %v1368_v58 = vpop.f32.mrf.mxu2 }
 0x6fe   :  { %v1369_v61 = vadd.f32 %v2441_v56, %v1368_v58 }
 0x75b   :  { %v1239_v31 = vpop.xlane.xlu1 %1238 }
 0x75c   :  { %v1243_v32 = vsub.f32 %v1209_v20, %v1239_v31 }
 0x75e   :  { %v1245_v33 = vmul.f32 1.442695, %v1243_v32 }
 0x760   :  { %2484 = vpow2.f32 %v1245_v33 }
 0x764   :  { %v1242_v34 = vpop.xlane.xlu2 %1241 }
 0x765   :  { %v1244_v35 = vsub.f32 %v1235_v19, %v1242_v34 }
 0x766   :  { %v2485_v36 = vpop.eup %2484 }
 0x767   :  { %v1247_v37 = vmul.f32 1.442695, %v1244_v35  ;;  %2318 = vmatmul.msk.f32.vlgmr.msrb.gmra.mxu3 %vm163_vm1, %v2485_v36  ;;  %v1249_v39 = vsel %vm163_vm1, %v2485_v36, 0.0 }
 0x768   :  { %1250 = vadd.xlane.f32.xlu0 %v1249_v39 }
 0x769   :  { %2486 = vpow2.f32 %v1247_v37 }
 0x76f   :  { %v2487_v40 = vpop.eup %2486  ;;  %2335 = vmatmul.msk.f32.vlgmr.msra.gmra.mxu3 %vm59_vm0, %v2990_v44 }
 0x770   :  { %2319 = vmatmul.msk.f32.vlgmr.msra.gmra.mxu0 %vm163_vm1, %v2487_v40  ;;  %v1252_v10 = vsel %vm163_vm1, %v2487_v40, 0.0  ;;  %v2350_v40 = vld [vmem:[%s3340_s8 + $0x28] sm:$0xff] }
 0x771   :  { %1253 = vadd.xlane.f32.xlu1 %v1252_v10 }
 0x777   :  { %2336 = vmatmul.msk.f32.gmra.mxu3 %vm59_vm0, %v2999_v46 }
 0x778   :  { %2342 = vmatmul.msk.f32.vlgmr.msrb.gmra.mxu0 %vm59_vm0, %v2990_v44 }
 0x780   :  { %2343 = vmatmul.msk.f32.gmra.mxu0 %vm59_vm0, %v2999_v46 }
 0x7db   :  { %v1251_v42 = vpop.xlane.xlu0 %1250 }
 0x7dc   :  { %2488 = vrcp.f32 %v1251_v42 }
 0x7e2   :  { %v2489_v45 = vpop.eup %2488 }
 0x7e4   :  { %v1254_v43 = vpop.xlane.xlu1 %1253 }
 0x7e5   :  { %2490 = vrcp.f32 %v1254_v43 }
 0x7ea   :  { %v1277_v47 = vpop.f32.mrf.mxu3 }
 0x7eb   :  { %v1303_v48 = vmul.f32 %v2489_v45, %v1277_v47  ;;  %v2491_v52 = vpop.eup %2490  ;;  %v2443_v47 = vld [vmem:[%s3337_s5 + $0x6] ss:$0 sm:$0xff] }
 0x7ed   :  { %2321 = vmatmul.msk.f32.vlgmr.msrb.gmra.mxu1 %vm163_vm1, %v1303_v48  ;;  %v1300_v51 = vpop.f32.mrf.mxu0 }
 0x7ee   :  { %v1304_v54 = vmul.f32 %v2491_v52, %v1300_v51 }
 0x7f2   :  { %v1398_v53 = vpop.f32.mrf.mxu3 }
 0x7f3   :  { %v1399_v55 = vadd.f32 %v2440_v49, %v1398_v53 }
 0x7f5   :  { %2322 = vmatmul.msk.f32.gmra.mxu1 %vm163_vm1, %v1304_v54  ;;  %v1431_v19 = vpop.f32.mrf.mxu0  ;;  %v2444_v54 = vld [vmem:[%s3335_s3 + $0x6] ss:$0 sm:$0xff] }
 0x7f6   :  { %2344 = vmatpush.xpose.msk.msra.mxu1 %vm163_vm1, %v1399_v55 }
 0x7fa   :  { %v1401_v59 = vpop.f32.mrf.mxu3  ;;  %1580 = vmatpush.msrb.mxu1 %v2350_v40 }
 0x7fb   :  { %v1402_v60 = vadd.f32 %v2440_v49, %v1401_v59 }
 0x7fd   :  { %2345 = vmatmul.msk.f32.vlgmr.msra.gmra.mxu1 %vm163_vm1, %v1366_v57  ;;  %2346 = vmatpush.xpose.msk.msrb.mxu2 %vm163_vm1, %v1402_v60  ;;  %v1434_v15 = vpop.f32.mrf.mxu0  ;;  %v2370_v60 = vld [vmem:[%s3338_s6 + $0xd8] sm:$0xff] }
 0x800   :  { %2347 = vmatmul.msk.f32.vlgmr.msrb.gmra.mxu2 %vm163_vm1, %v1369_v61  ;;  %v2369_v61 = vld [vmem:[%s3338_s6 + $0xd0] sm:$0xff] }
 0x801   :  { %1612 = vmatpush.msra.mxu2 %v2356_v14 }
 0x803   :  { %1613 = vmatpush.msra.mxu2 %v2355_v23  ;;  %v2390_v23 = vld [vmem:[%s3336_s4 + $0xe0] sm:$0xff] }
 0x805   :  { %1614 = vmatpush.msra.mxu2 %v2354_v38 }
 0x807   :  { %1615 = vmatpush.msra.mxu2 %v2353_v26 }
 0x808   :  { %2358 = vmatmul.msk.f32.vlgmr.msra.gmra.mxu2 %vm59_vm0, %v3164_v27 }
 0x810   :  { %2359 = vmatmul.msk.f32.gmra.mxu2 %vm59_vm0, %v3171_v28 }
 0x86a   :  { %v1330_v2 = vpop.f32.mrf.mxu1 }
 0x86b   :  { %v3125_v3 = vadd.f32 %v1330_v2, %v3035_v8  ;;  %v2442_v8 = vld [vmem:[%s3339_s7 + $0x5] ss:$0 sm:$0xff] }
 0x86c   :  { %v1432_v24 = vadd.f32 %v2442_v8, %v1431_v19  ;;  %v1435_v41 = vadd.f32 %v2442_v8, %v1434_v15 }
 0x86e   :  { %1527 = vmatpush.msrb.mxu3 %v1432_v24  ;;  %1550 = vmatpush.msra.mxu0 %v1435_v41  ;;  %v2392_v24 = vld [vmem:[%s3336_s4 + $0xf0] sm:$0xff]  ;;  %v2384_v41 = vld [vmem:[%s3334_s2 + $0xe8] sm:$0xff] }
 0x870   :  { %1678 = vmatpush.msrb.mxu0 %v2370_v60  ;;  %v2398_v60 = vld [vmem:[%s3338_s6 + $0xe8] sm:$0xff] }
 0x872   :  { %v1333_v4 = vpop.f32.mrf.mxu1  ;;  %1679 = vmatpush.msrb.mxu0 %v2369_v61  ;;  %v2397_v61 = vld [vmem:[%s3338_s6 + $0xe0] sm:$0xff] }
 0x873   :  { %v3128_v5 = vadd.f32 %v1333_v4, %v3038_v13  ;;  %v2363_v13 = vld [vmem:[%s3336_s4 + $0xd8] sm:$0xff] }
 0x874   :  { %1645 = vmatpush.msra.mxu3 %v2363_v13  ;;  %1680 = vmatpush.msrb.mxu0 %v2368_v62  ;;  %v2386_v13 = vld [vmem:[%s3334_s2 + $0xf8] sm:$0xff] }
 0x876   :  { %1646 = vmatpush.msra.mxu3 %v2362_v9  ;;  %1681 = vmatpush.msrb.mxu0 %v2367_v63  ;;  %v2391_v9 = vld [vmem:[%s3336_s4 + $0xe8] sm:$0xff] }
 0x878   :  { %1647 = vmatpush.msra.mxu3 %v2361_v22  ;;  %v2385_v22 = vld [vmem:[%s3334_s2 + $0xf0] sm:$0xff] }
 0x87a   :  { %v1460_v6 = vpop.f32.mrf.mxu1  ;;  %1648 = vmatpush.msra.mxu3 %v2360_v25  ;;  %v2383_v25 = vld [vmem:[%s3334_s2 + $0xe0] sm:$0xff]  ;;  %s2553_s2 = smov 8  }
 0x87b   :  { %v1461_v12 = vadd.f32 %v3043_v17, %v1460_v6 }
 0x87d   :  { %v1489_v18 = vsel %vm163_vm1, %v1461_v12, -inf }
 0x87e   :  { %1490 = vmax.xlane.f32.xlu2 %v1489_v18 }
 0x883   :  { %v1486_v20 = vpop.f32.mrf.mxu2 }
 0x884   :  { %v1487_v21 = vadd.f32 %v3050_v16, %v1486_v20 }
 0x886   :  { %v1492_v7 = vsel %vm163_vm1, %v1487_v21, -inf }
 0x887   :  { %1493 = vmax.xlane.f32.xlu0 %v1492_v7 }
 0x88b   :  { %v1617_v48 = vpop.f32.mrf.mxu2 }
 0x88c   :  { %v1618_v55 = vadd.f32 %v2444_v54, %v1617_v48 }
 0x893   :  { %v1620_v56 = vpop.f32.mrf.mxu2 }
 0x894   :  { %v1621_v59 = vadd.f32 %v2444_v54, %v1620_v56 }
 0x8f1   :  { %v1491_v29 = vpop.xlane.xlu2 %1490 }
 0x8f2   :  { %v1495_v30 = vsub.f32 %v1461_v12, %v1491_v29 }
 0x8f4   :  { %v1497_v31 = vmul.f32 1.442695, %v1495_v30 }
 0x8f6   :  { %2492 = vpow2.f32 %v1497_v31 }
 0x8fa   :  { %v1494_v32 = vpop.xlane.xlu0 %1493 }
 0x8fb   :  { %v1496_v33 = vsub.f32 %v1487_v21, %v1494_v32 }
 0x8fc   :  { %v2493_v34 = vpop.eup %2492 }
 0x8fd   :  { %v1499_v35 = vmul.f32 1.442695, %v1496_v33  ;;  %2348 = vmatmul.msk.f32.vlgmr.msrb.gmra.mxu3 %vm163_vm1, %v2493_v34  ;;  %v1501_v36 = vsel %vm163_vm1, %v2493_v34, 0.0 }
 0x8fe   :  { %1502 = vadd.xlane.f32.xlu1 %v1501_v36 }
 0x8ff   :  { %2494 = vpow2.f32 %v1499_v35 }
 0x905   :  { %v2495_v37 = vpop.eup %2494  ;;  %2365 = vmatmul.msk.f32.vlgmr.msra.gmra.mxu3 %vm59_vm0, %v2990_v44 }
 0x906   :  { %2349 = vmatmul.msk.f32.vlgmr.msra.gmra.mxu0 %vm163_vm1, %v2495_v37  ;;  %v1504_v39 = vsel %vm163_vm1, %v2495_v37, 0.0  ;;  %v2380_v37 = vld [vmem:[%s3340_s8 + $0x30] sm:$0xff] }
 0x907   :  { %1505 = vadd.xlane.f32.xlu2 %v1504_v39 }
 0x90d   :  { %2366 = vmatmul.msk.f32.gmra.mxu3 %vm59_vm0, %v2999_v46 }
 0x90e   :  { %2372 = vmatmul.msk.f32.vlgmr.msrb.gmra.mxu0 %vm59_vm0, %v2990_v44 }
 0x916   :  { %2373 = vmatmul.msk.f32.gmra.mxu0 %vm59_vm0, %v2999_v46 }
 0x971   :  { %v1503_v10 = vpop.xlane.xlu1 %1502 }
 0x972   :  { %2496 = vrcp.f32 %v1503_v10 }
 0x978   :  { %v2497_v42 = vpop.eup %2496 }
 0x97a   :  { %v1506_v11 = vpop.xlane.xlu2 %1505 }
 0x97b   :  { %2498 = vrcp.f32 %v1506_v11 }
 0x980   :  { %v1529_v43 = vpop.f32.mrf.mxu3 }
 0x981   :  { %v1555_v45 = vmul.f32 %v2497_v42, %v1529_v43  ;;  %v2499_v50 = vpop.eup %2498  ;;  %v2446_v43 = vld [vmem:[%s3337_s5 + $0x7] ss:$0 sm:$0xff] }
 0x983   :  { %2351 = vmatmul.msk.f32.vlgmr.msrb.gmra.mxu1 %vm163_vm1, %v1555_v45  ;;  %v1552_v49 = vpop.f32.mrf.mxu0 }
 0x984   :  { %v1556_v52 = vmul.f32 %v2499_v50, %v1552_v49 }
 0x988   :  { %v1650_v51 = vpop.f32.mrf.mxu3 }
 0x989   :  { %v1651_v53 = vadd.f32 %v2443_v47, %v1650_v51 }
 0x98b   :  { %2352 = vmatmul.msk.f32.gmra.mxu1 %vm163_vm1, %v1556_v52  ;;  %v1683_v8 = vpop.f32.mrf.mxu0  ;;  %v2447_v52 = vld [vmem:[%s3335_s3 + $0x7] ss:$0 sm:$0xff] }
 0x98c   :  { %2374 = vmatpush.xpose.msk.msra.mxu1 %vm163_vm1, %v1651_v53 }
 0x990   :  { %v1653_v57 = vpop.f32.mrf.mxu3  ;;  %1832 = vmatpush.msrb.mxu1 %v2380_v37 }
 0x991   :  { %v1654_v58 = vadd.f32 %v2443_v47, %v1653_v57 }
 0x993   :  { %2375 = vmatmul.msk.f32.vlgmr.msra.gmra.mxu1 %vm163_vm1, %v1618_v55  ;;  %2376 = vmatpush.xpose.msk.msrb.mxu2 %vm163_vm1, %v1654_v58  ;;  %v1686_v14 = vpop.f32.mrf.mxu0  ;;  %v2400_v58 = vld [vmem:[%s3338_s6 + $0xf8] sm:$0xff] }
 0x996   :  { %2377 = vmatmul.msk.f32.vlgmr.msrb.gmra.mxu2 %vm163_vm1, %v1621_v59  ;;  %v2399_v59 = vld [vmem:[%s3338_s6 + $0xf0] sm:$0xff] }
 0x997   :  { %1864 = vmatpush.msra.mxu2 %v2386_v13 }
 0x999   :  { %1865 = vmatpush.msra.mxu2 %v2385_v22 }
 0x99b   :  { %1866 = vmatpush.msra.mxu2 %v2384_v41 }
 0x99d   :  { %1867 = vmatpush.msra.mxu2 %v2383_v25 }
 0x99e   :  { %2388 = vmatmul.msk.f32.vlgmr.msra.gmra.mxu2 %vm59_vm0, %v3164_v27 }
 0x9a6   :  { %2389 = vmatmul.msk.f32.gmra.mxu2 %vm59_vm0, %v3171_v28 }
 0xa00   :  { %v1582_v0 = vpop.f32.mrf.mxu1 }
 0xa01   :  { %v3215_v1 = vadd.f32 %v1582_v0, %v3125_v3  ;;  %v2445_v3 = vld [vmem:[%s3339_s7 + $0x6] ss:$0 sm:$0xff] }
 0xa02   :  { %v1684_v19 = vadd.f32 %v2445_v3, %v1683_v8  ;;  %v1687_v15 = vadd.f32 %v2445_v3, %v1686_v14 }
 0xa04   :  { %1779 = vmatpush.msrb.mxu3 %v1684_v19  ;;  %1802 = vmatpush.msra.mxu0 %v1687_v15  ;;  %v2410_v15 = vld [vmem:[%s3340_s8 + $0x38] sm:$0xff] }
 0xa06   :  { %1930 = vmatpush.msrb.mxu0 %v2400_v58 }
 0xa08   :  { %v1585_v2 = vpop.f32.mrf.mxu1  ;;  %1931 = vmatpush.msrb.mxu0 %v2399_v59 }
 0xa09   :  { %v3218_v4 = vadd.f32 %v1585_v2, %v3128_v5  ;;  %v2393_v5 = vld [vmem:[%s3336_s4 + $0xf8] sm:$0xff] }
 0xa0a   :  { %1897 = vmatpush.msra.mxu3 %v2393_v5  ;;  %1932 = vmatpush.msrb.mxu0 %v2398_v60 }
 0xa0c   :  { %1898 = vmatpush.msra.mxu3 %v2392_v24  ;;  %1933 = vmatpush.msrb.mxu0 %v2397_v61 }
 0xa0e   :  { %1899 = vmatpush.msra.mxu3 %v2391_v9 }
 0xa10   :  { %v1712_v6 = vpop.f32.mrf.mxu1  ;;  %1900 = vmatpush.msra.mxu3 %v2390_v23 }
 0xa11   :  { %v1713_v12 = vadd.f32 %v3043_v17, %v1712_v6 }
 0xa13   :  { %v1741_v18 = vsel %vm163_vm1, %v1713_v12, -inf }
 0xa14   :  { %1742 = vmax.xlane.f32.xlu0 %v1741_v18 }
 0xa19   :  { %v1738_v20 = vpop.f32.mrf.mxu2 }
 0xa1a   :  { %v1739_v21 = vadd.f32 %v3050_v16, %v1738_v20 }
 0xa1c   :  { %v1744_v7 = vsel %vm163_vm1, %v1739_v21, -inf }
 0xa1d   :  { %1745 = vmax.xlane.f32.xlu1 %v1744_v7 }
 0xa21   :  { %v1869_v45 = vpop.f32.mrf.mxu2 }
 0xa22   :  { %v1870_v53 = vadd.f32 %v2447_v52, %v1869_v45 }
 0xa29   :  { %v1872_v54 = vpop.f32.mrf.mxu2 }
 0xa2a   :  { %v1873_v57 = vadd.f32 %v2447_v52, %v1872_v54 }
 0xa87   :  { %v1743_v38 = vpop.xlane.xlu0 %1742 }
 0xa88   :  { %v1747_v26 = vsub.f32 %v1713_v12, %v1743_v38 }
 0xa8a   :  { %v1749_v29 = vmul.f32 1.442695, %v1747_v26 }
 0xa8c   :  { %2500 = vpow2.f32 %v1749_v29 }
 0xa90   :  { %v1746_v30 = vpop.xlane.xlu1 %1745 }
 0xa91   :  { %v1748_v31 = vsub.f32 %v1739_v21, %v1746_v30 }
 0xa92   :  { %v2501_v32 = vpop.eup %2500 }
 0xa93   :  { %v1751_v33 = vmul.f32 1.442695, %v1748_v31  ;;  %2378 = vmatmul.msk.f32.vlgmr.msrb.gmra.mxu3 %vm163_vm1, %v2501_v32  ;;  %v1753_v34 = vsel %vm163_vm1, %v2501_v32, 0.0  ;;  %v2449_v32 = vld [vmem:[%s3342_s10] ss:$0 sm:$0xff] }
 0xa94   :  { %1754 = vadd.xlane.f32.xlu2 %v1753_v34 }
 0xa95   :  { %2502 = vpow2.f32 %v1751_v33 }
 0xa9b   :  { %v2503_v35 = vpop.eup %2502  ;;  %2395 = vmatmul.msk.f32.vlgmr.msra.gmra.mxu3 %vm59_vm0, %v2990_v44 }
 0xa9c   :  { %2379 = vmatmul.msk.f32.vlgmr.msra.gmra.mxu0 %vm163_vm1, %v2503_v35  ;;  %v1756_v36 = vsel %vm163_vm1, %v2503_v35, 0.0 }
 0xa9d   :  { %1757 = vadd.xlane.f32.xlu0 %v1756_v36 }
 0xaa3   :  { %2396 = vmatmul.msk.f32.gmra.mxu3 %vm59_vm0, %v2999_v46 }
 0xaa4   :  { %2402 = vmatmul.msk.f32.vlgmr.msrb.gmra.mxu0 %vm59_vm0, %v2990_v44 }
 0xaac   :  { %2403 = vmatmul.msk.f32.gmra.mxu0 %vm59_vm0, %v2999_v46  ;;  %v2448_v46 = vld [vmem:[%s3339_s7 + $0x7] ss:$0 sm:$0xff] }
 0xb07   :  { %v1755_v39 = vpop.xlane.xlu2 %1754 }
 0xb08   :  { %2504 = vrcp.f32 %v1755_v39 }
 0xb0e   :  { %v2505_v10 = vpop.eup %2504 }
 0xb10   :  { %v1758_v40 = vpop.xlane.xlu0 %1757 }
 0xb11   :  { %2506 = vrcp.f32 %v1758_v40 }
 0xb16   :  { %v1781_v11 = vpop.f32.mrf.mxu3 }
 0xb17   :  { %v1807_v42 = vmul.f32 %v2505_v10, %v1781_v11  ;;  %v2507_v48 = vpop.eup %2506 }
 0xb19   :  { %2381 = vmatmul.msk.f32.vlgmr.msrb.gmra.mxu1 %vm163_vm1, %v1807_v42  ;;  %v1804_v47 = vpop.f32.mrf.mxu0 }
 0xb1a   :  { %v1808_v50 = vmul.f32 %v2507_v48, %v1804_v47 }
 0xb1e   :  { %v1902_v49 = vpop.f32.mrf.mxu3 }
 0xb1f   :  { %v1903_v51 = vadd.f32 %v2446_v43, %v1902_v49 }
 0xb21   :  { %2382 = vmatmul.msk.f32.gmra.mxu1 %vm163_vm1, %v1808_v50 }
 0xb22   :  { %2404 = vmatpush.xpose.msk.msra.mxu1 %vm163_vm1, %v1903_v51 }
 0xb26   :  { %v1905_v55 = vpop.f32.mrf.mxu3  ;;  %2084 = vmatpush.msrb.mxu1 %v2410_v15 }
 0xb27   :  { %v1906_v56 = vadd.f32 %v2446_v43, %v1905_v55  ;;  %v2550_v43 = vmov 32.0  }
 0xb29   :  { %2405 = vmatmul.msk.f32.vlgmr.msra.gmra.mxu1 %vm163_vm1, %v1870_v53  ;;  %2406 = vmatpush.xpose.msk.msrb.mxu2 %vm163_vm1, %v1906_v56 }
 0xb2c   :  { %2407 = vmatmul.msk.f32.vlgmr.msrb.gmra.mxu2 %vm163_vm1, %v1873_v57 }
 0xb96   :  { %v1834_v62 = vpop.f32.mrf.mxu1 }
 0xb97   :  { %v1840_v63 = vadd.f32 %v1834_v62, %v3215_v1  ;;  %v1935_v1 = vpop.f32.mrf.mxu0 }
 0xb98   :  { %v1936_v7 = vadd.f32 %v2448_v46, %v1935_v1 }
 0xb9a   :  { %2031 = vmatpush.msrb.mxu3 %v1936_v7  ;;  %v2450_v7 = vld [vmem:[%s3343_s11] ss:$0 sm:$0xff]  ;;  %s2551_s11 = smov [#allocation2]  }
 0xb9b   :  { %s2171_s9 = sshll.u32 %s2551_s11, 4  ;;  %s2172_s9 = int_to_ptr.vmem [resolvable:$true] %s2171_s9 }
 0xb9e   :  { %v1837_v0 = vpop.f32.mrf.mxu1 }
 0xb9f   :  { %v1841_v2 = vadd.f32 %v1837_v0, %v3218_v4  ;;  %v1938_v4 = vpop.f32.mrf.mxu0 }
 0xba0   :  { %v1939_v3 = vadd.f32 %v2448_v46, %v1938_v4 }
 0xba2   :  { %2054 = vmatpush.msra.mxu0 %v1939_v3 }
 0xba6   :  { %v1964_v6 = vpop.f32.mrf.mxu1 }
 0xba7   :  { %v1965_v12 = vadd.f32 %v3043_v17, %v1964_v6 }
 0xba9   :  { %v1993_v18 = vsel %vm163_vm1, %v1965_v12, -inf }
 0xbaa   :  { %1994 = vmax.xlane.f32.xlu1 %v1993_v18 }
 0xbaf   :  { %v1990_v20 = vpop.f32.mrf.mxu2 }
 0xbb0   :  { %v1991_v21 = vadd.f32 %v3050_v16, %v1990_v20 }
 0xbb2   :  { %v1996_v44 = vsel %vm163_vm1, %v1991_v21, -inf }
 0xbb3   :  { %1997 = vmax.xlane.f32.xlu2 %v1996_v44 }
 0xc1d   :  { %v1995_v17 = vpop.xlane.xlu1 %1994 }
 0xc1e   :  { %v1999_v8 = vsub.f32 %v1965_v12, %v1995_v17 }
 0xc20   :  { %v2001_v19 = vmul.f32 1.442695, %v1999_v8  ;;  %v2451_v8 = vld [vmem:[%s3344_s12] ss:$0 sm:$0xff]  ;;  %s2552_s12 = smov 128  }
 0xc22   :  { %2508 = vpow2.f32 %v2001_v19 }
 0xc26   :  { %v1998_v5 = vpop.xlane.xlu2 %1997 }
 0xc27   :  { %v2000_v24 = vsub.f32 %v1991_v21, %v1998_v5 }
 0xc28   :  { %v2509_v16 = vpop.eup %2508 }
 0xc29   :  { %v2003_v13 = vmul.f32 1.442695, %v2000_v24  ;;  %2408 = vmatmul.msk.f32.vlgmr.msrb.gmra.mxu3 %vm163_vm1, %v2509_v16  ;;  %v2005_v9 = vsel %vm163_vm1, %v2509_v16, 0.0 }
 0xc2a   :  { %2006 = vadd.xlane.f32.xlu0 %v2005_v9 }
 0xc2b   :  { %2510 = vpow2.f32 %v2003_v13 }
 0xc31   :  { %v2511_v14 = vpop.eup %2510 }
 0xc32   :  { %2409 = vmatmul.msk.f32.vlgmr.msra.gmra.mxu0 %vm163_vm1, %v2511_v14  ;;  %v2008_v22 = vsel %vm163_vm1, %v2511_v14, 0.0 }
 0xc33   :  { %2009 = vadd.xlane.f32.xlu1 %v2008_v22 }
 0xc9d   :  { %v2007_v23 = vpop.xlane.xlu0 %2006 }
 0xc9e   :  { %2512 = vrcp.f32 %v2007_v23 }
 0xca4   :  { %v2513_v25 = vpop.eup %2512 }
 0xca6   :  { %v2010_v41 = vpop.xlane.xlu1 %2009 }
 0xca7   :  { %2514 = vrcp.f32 %v2010_v41 }
 0xca8   :  { %2516 = vrcp.f32 %v2550_v43 }
 0xcac   :  { %v2033_v38 = vpop.f32.mrf.mxu3 }
 0xcad   :  { %v2059_v26 = vmul.f32 %v2513_v25, %v2033_v38  ;;  %v2515_v30 = vpop.eup %2514 }
 0xcae   :  { %v2517_v45 = vpop.eup %2516 }
 0xcaf   :  { %2411 = vmatmul.msk.f32.vlgmr.msrb.gmra.mxu1 %vm163_vm1, %v2059_v26  ;;  %v2056_v29 = vpop.f32.mrf.mxu0  ;;  %v2109_v47 = vmul.f32 32.0, %v2517_v45  ;;  %vm2113_vm2 = vweird.f32 %v2517_v45 }
 0xcb0   :  { %v2060_v31 = vmul.f32 %v2515_v30, %v2056_v29 }
 0xcb1   :  { %v2110_v48 = vsub.f32 1.0, %v2109_v47 }
 0xcb3   :  { %v2111_v49 = vmul.f32 %v2517_v45, %v2110_v48 }
 0xcb5   :  { %v2112_v50 = vadd.f32 %v2517_v45, %v2111_v49 }
 0xcb7   :  { %2412 = vmatmul.msk.f32.gmra.mxu1 %vm163_vm1, %v2060_v31 }
 0xd2c   :  { %v2086_v33 = vpop.f32.mrf.mxu1 }
 0xd2d   :  { %v2092_v34 = vadd.f32 %v2086_v33, %v1840_v63 }
 0xd2f   :  { %v2098_v35 = vadd.f32 %v2449_v32, %v2092_v34 }
 0xd31   :  { %v2100_v36 = vadd.f32 %v3164_v27, %v2098_v35  ;;  %v2114_v27 = vsel %vm2113_vm2, %v2517_v45, %v2112_v50 }
 0xd33   :  { %v2102_v37 = vsel %vm59_vm0, %v2100_v36, 0.0 }
 0xd34   :  { %2103 = vadd.xlane.f32.xlu2 %v2102_v37  ;;  %v2089_v39 = vpop.f32.mrf.mxu1 }
 0xd35   :  { %v2093_v40 = vadd.f32 %v2089_v39, %v1841_v2 }
 0xd37   :  { %v2099_v10 = vadd.f32 %v2449_v32, %v2093_v40 }
 0xd39   :  { %v2101_v11 = vadd.f32 %v3171_v28, %v2099_v10 }
 0xd3b   :  { %v2105_v42 = vsel %vm59_vm0, %v2101_v11, 0.0 }
 0xd3c   :  { %2106 = vadd.xlane.f32.xlu0 %v2105_v42 }
 0xda7   :  { %v2104_v51 = vpop.xlane.xlu2 %2103 }
 0xda8   :  { %v2115_v52 = vmul.f32 %v2114_v27, %v2104_v51 }
 0xdaa   :  { %v2117_v53 = vsub.f32 %v2100_v36, %v2115_v52 }
 0xdac   :  { %v2119_v54 = vmul.f32 %v2117_v53, %v2117_v53 }
 0xdae   :  { %v2121_v55 = vsel %vm59_vm0, %v2119_v54, 0.0 }
 0xdaf   :  { %2122 = vadd.xlane.f32.xlu1 %v2121_v55  ;;  %v2107_v28 = vpop.xlane.xlu0 %2106 }
 0xdb0   :  { %v2116_v56 = vmul.f32 %v2114_v27, %v2107_v28 }
 0xdb2   :  { %v2118_v57 = vsub.f32 %v2101_v11, %v2116_v56 }
 0xdb4   :  { %v2120_v58 = vmul.f32 %v2118_v57, %v2118_v57 }
 0xdb6   :  { %v2124_v59 = vsel %vm59_vm0, %v2120_v58, 0.0 }
 0xdb7   :  { %2125 = vadd.xlane.f32.xlu2 %v2124_v59 }
 0xe22   :  { %v2123_v60 = vpop.xlane.xlu1 %2122 }
 0xe23   :  { %v2127_v61 = vmul.f32 %v2123_v60, %v2114_v27 }
 0xe25   :  { %v2129_v62 = vadd.f32 1e-05, %v2127_v61 }
 0xe27   :  { %2518 = vrsqrt.f32 %v2129_v62  ;;  %vm2137_vm4 = vweird.f32 %v2129_v62 }
 0xe2a   :  { %v2126_v63 = vpop.xlane.xlu2 %2125 }
 0xe2b   :  { %v2128_v0 = vmul.f32 %v2126_v63, %v2114_v27 }
 0xe2d   :  { %v2519_v2 = vpop.eup %2518  ;;  %v2130_v6 = vadd.f32 1e-05, %v2128_v0 }
 0xe2e   :  { %v2132_v12 = vmul.f32 %v2519_v2, %v2129_v62  ;;  %vm2138_vm3 = vweird.f32 %v2519_v2 }
 0xe2f   :  { %2520 = vrsqrt.f32 %v2130_v6  ;;  %vm2139_vm5 = vmor %vm2137_vm4, %vm2138_vm3  ;;  %vm2147_vm7 = vweird.f32 %v2130_v6 }
 0xe30   :  { %v2133_v18 = vmul.f32 %v2519_v2, %v2132_v12 }
 0xe32   :  { %v2134_v20 = vmul.f32 0.5, %v2133_v18 }
 0xe34   :  { %v2135_v21 = vsub.f32 1.5, %v2134_v20 }
 0xe35   :  { %v2521_v44 = vpop.eup %2520 }
 0xe36   :  { %v2136_v46 = vmul.f32 %v2519_v2, %v2135_v21  ;;  %v2142_v1 = vmul.f32 %v2521_v44, %v2130_v6  ;;  %vm2148_vm6 = vweird.f32 %v2521_v44 }
 0xe37   :  { %vm2149_vm8 = vmor %vm2147_vm7, %vm2148_vm6 }
 0xe38   :  { %v2140_v4 = vsel %vm2139_vm5, %v2519_v2, %v2136_v46  ;;  %v2143_v3 = vmul.f32 %v2521_v44, %v2142_v1 }
 0xe39   :  { %v2151_v17 = vmul.f32 %v2140_v4, %v2117_v53 }
 0xe3a   :  { %v2144_v19 = vmul.f32 0.5, %v2143_v3 }
 0xe3b   :  { %v2157_v5 = vmul.f32 %v2450_v7, %v2151_v17 }
 0xe3c   :  { %v2145_v24 = vsub.f32 1.5, %v2144_v19 }
 0xe3d   :  { %v2163_v16 = vadd.f32 %v2451_v8, %v2157_v5 }
 0xe3e   :  { %v2146_v13 = vmul.f32 %v2521_v44, %v2145_v24 }
 0xe3f   :  { %2165 = vst.msk [vmem:[#allocation2] sm:$0xff] %vm59_vm0, %v2163_v16 }
 0xe40   :  { %v2150_v9 = vsel %vm2149_vm8, %v2521_v44, %v2146_v13 }
 0xe41   :  { %v2152_v14 = vmul.f32 %v2150_v9, %v2118_v57 }
 0xe43   :  { %v2158_v22 = vmul.f32 %v2450_v7, %v2152_v14 }
 0xe45   :  { %v2164_v15 = vadd.f32 %v2451_v8, %v2158_v22 }
 0xe47   :  { %2166 = vst.msk [vmem:[#allocation2 + $0x8] sm:$0xff] %vm59_vm0, %v2164_v15 }
 0xe48   :  { %2179 = dma.vmem_to_hbm [thread:$0]  %s2172_s9, 256, %s2174_s18, [#allocation3], %s2552_s12, %s2552_s12, %s2553_s2  }
 0xe49   :  { %2548 = dma.done.wait [#allocation3], 256  }
 0xe4a   :  { %2549 = vsyncadd [#allocation3], 4294967040 }
 0xe4b   :  { %2184 = vsyncpa [#allocation3], 1 }

</bundles_post_ra>
